<compile_context>
chip_gen: v7x
topology: tpu7x:2x2x1
jax: 0.10.0
libtpu: 0.0.40
codegen_flags: <defaults>
</compile_context>

<pallas_src>
import functools

import jax
import jax.numpy as jnp
from jax.experimental import pallas as pl
from jax.experimental.pallas import tpu as pltpu

SIZE = 28 * 28
NUM_CLASSES = 10
HIDDEN = (512, 256, 128, 128)
BN_EPS = 1e-5
PAD_OUT = 128          # lane-dense padded logits width
NEG_BIG = -1.0e30      # pad-column bias; exp(NEG_BIG - m) == 0 exactly in f32


def _bn_relu(h, gamma, beta):
    """Training-mode BatchNorm1d (+ReLU), single-pass stats, folded affine. f32 math."""
    mean = jnp.mean(h, axis=0, keepdims=True)
    mean_sq = jnp.mean(h * h, axis=0, keepdims=True)
    var = mean_sq - mean * mean
    scale = jax.lax.rsqrt(var + BN_EPS) * gamma
    shift = beta - mean * scale
    return jnp.maximum(h * scale + shift, 0.0)


def mlp_kernel(
    x_ref,
    w0_ref, g1_ref, be1_ref,
    w1_ref, g2_ref, be2_ref,
    w2_ref, g3_ref, be3_ref,
    w3_ref, g4_ref, be4_ref,
    w4_ref, b4_ref,
    out_ref,
):
    # fc0 (bias dropped: cancelled by BN mean) -> bn1 -> relu
    h = jnp.dot(x_ref[...], w0_ref[...], preferred_element_type=jnp.float32)
    h = _bn_relu(h, g1_ref[...], be1_ref[...])

    # fc1 -> bn2 -> relu
    h = jnp.dot(h.astype(jnp.bfloat16), w1_ref[...], preferred_element_type=jnp.float32)
    h = _bn_relu(h, g2_ref[...], be2_ref[...])

    # fc2 -> bn3 -> relu
    h = jnp.dot(h.astype(jnp.bfloat16), w2_ref[...], preferred_element_type=jnp.float32)
    h = _bn_relu(h, g3_ref[...], be3_ref[...])

    # fc3 -> bn4 -> relu
    h = jnp.dot(h.astype(jnp.bfloat16), w3_ref[...], preferred_element_type=jnp.float32)
    h = _bn_relu(h, g4_ref[...], be4_ref[...])

    # fc4 (padded to 128 lanes) -> log_softmax; pad columns carry bias -1e30 so
    # they contribute 0 to the sum-exp and never win the max.
    logits = jnp.dot(h.astype(jnp.bfloat16), w4_ref[...],
                     preferred_element_type=jnp.float32) + b4_ref[...]
    m = jnp.max(logits, axis=-1, keepdims=True)
    z = logits - m
    lse = jnp.log(jnp.sum(jnp.exp(z), axis=-1, keepdims=True))
    out_ref[...] = z - lse


def init_params(key):
    """PyTorch-default init: Linear uniform(+-1/sqrt(fan_in)); BN gamma=1, beta=0."""
    dims = (SIZE,) + HIDDEN + (NUM_CLASSES,)
    p = {}
    for i in range(5):
        fan_in, fan_out = dims[i], dims[i + 1]
        key, kw, kb = jax.random.split(key, 3)
        bound = 1.0 / float(fan_in) ** 0.5
        # stored as (in, out): transpose of torch's (out, in)
        p[f"w{i}"] = jax.random.uniform(kw, (fan_in, fan_out), jnp.float32, -bound, bound)
        p[f"b{i}"] = jax.random.uniform(kb, (1, fan_out), jnp.float32, -bound, bound)
    for i in range(1, 5):
        f = HIDDEN[i - 1]
        p[f"g{i}"] = jnp.ones((1, f), jnp.float32)
        p[f"be{i}"] = jnp.zeros((1, f), jnp.float32)
    return p


def prepare_params(p):
    """Kernel-side parameter layout: bf16 weights, b0..b3 dropped, fc4 lane-padded."""
    flat = []
    for i in range(4):
        flat += [p[f"w{i}"].astype(jnp.bfloat16), p[f"g{i+1}"], p[f"be{i+1}"]]
    w4 = jnp.zeros((HIDDEN[-1], PAD_OUT), jnp.float32).at[:, :NUM_CLASSES].set(p["w4"])
    b4 = jnp.full((1, PAD_OUT), NEG_BIG, jnp.float32).at[:, :NUM_CLASSES].set(p["b4"][0])
    flat += [w4.astype(jnp.bfloat16), b4]
    return tuple(flat)


def _vmem_limit_bytes(batch):
    # bf16 weights (incl. padded fc4) + small f32 params + activations + output,
    # with 2x headroom; capped at 64 MiB so the same budget also fits v7x.
    w = 2 * (SIZE * 512 + 512 * 256 + 256 * 128 + 128 * 128 + 128 * PAD_OUT)
    small = 4 * (2 * sum(HIDDEN) + PAD_OUT)
    acts = 6 * batch * (SIZE + 512 + 256 + 128 + 128)   # f32 + bf16 copies
    out = 4 * batch * PAD_OUT
    est = 2 * (w + small + acts + out) + (4 << 20)
    return int(min(max(est, 16 << 20), 64 << 20))


@jax.jit
def mlp_forward(x, *prepped_params):
    # x: any shape; flattened to (-1, SIZE) like x.view(-1, self.size).
    # Matmul inputs are bf16 (halves input/weight HBM traffic); accumulation is f32.
    x2d = x.reshape(-1, SIZE).astype(jnp.bfloat16)
    batch = x2d.shape[0]
    vmem = pl.BlockSpec(memory_space=pltpu.MemorySpace.VMEM)
    # TODO(synk): training-mode BN couples rows, so the batch axis is not gridded;
    # very large batches should use eval-mode BN or a two-phase stats reduction.
    padded = pl.pallas_call(
        mlp_kernel,
        out_shape=jax.ShapeDtypeStruct((batch, PAD_OUT), jnp.float32),
        in_specs=[vmem] * (1 + len(prepped_params)),
        out_specs=vmem,
        compiler_params=pltpu.CompilerParams(
            vmem_limit_bytes=_vmem_limit_bytes(batch)),
    )(x2d, *prepped_params)
    return padded[:, :NUM_CLASSES]


def _reference(x, p):
    """Pure-JAX f32 reference (with the original biases) for a sanity check."""
    h = x.reshape(-1, SIZE).astype(jnp.float32)
    for i in range(4):
        h = h @ p[f"w{i}"] + p[f"b{i}"]
        mean = jnp.mean(h, axis=0, keepdims=True)
        var = jnp.mean((h - mean) ** 2, axis=0, keepdims=True)
        h = (h - mean) * jax.lax.rsqrt(var + BN_EPS) * p[f"g{i+1}"] + p[f"be{i+1}"]
        h = jnp.maximum(h, 0.0)
    logits = h @ p["w4"] + p["b4"]
    return jax.nn.log_softmax(logits, axis=-1)


if __name__ == "__main__":
    key = jax.random.PRNGKey(0)
    kx, kp = jax.random.split(key)
    # small MNIST-like batch: (8, 1, 28, 28) NCHW, flattened to (8, 784) inside
    x = jax.random.normal(kx, (8, 1, 28, 28), jnp.float32)
    params = init_params(kp)
    prepped = prepare_params(params)

    log_probs = mlp_forward(x, *prepped)
    jax.block_until_ready(log_probs)

    assert log_probs.shape == (8, NUM_CLASSES)
    # log_softmax rows should sum to ~1 in probability space
    assert jnp.allclose(jnp.sum(jnp.exp(log_probs), axis=-1), 1.0, atol=1e-4)
    # bf16-matmul kernel should track the f32 reference closely
    ref = _reference(x, params)
    assert jnp.allclose(log_probs, ref, atol=0.25), float(jnp.max(jnp.abs(log_probs - ref)))
    print("KERNEL_OK")
</pallas_src>

<mosaic_0001>
module attributes {stable_mosaic.version = 11 : i64} {
  func.func @mlp_kernel(%arg0: memref<8x784xbf16, #tpu.memory_space<vmem>>, %arg1: memref<784x512xbf16, #tpu.memory_space<vmem>>, %arg2: memref<1x512xf32, #tpu.memory_space<vmem>>, %arg3: memref<1x512xf32, #tpu.memory_space<vmem>>, %arg4: memref<512x256xbf16, #tpu.memory_space<vmem>>, %arg5: memref<1x256xf32, #tpu.memory_space<vmem>>, %arg6: memref<1x256xf32, #tpu.memory_space<vmem>>, %arg7: memref<256x128xbf16, #tpu.memory_space<vmem>>, %arg8: memref<1x128xf32, #tpu.memory_space<vmem>>, %arg9: memref<1x128xf32, #tpu.memory_space<vmem>>, %arg10: memref<128x128xbf16, #tpu.memory_space<vmem>>, %arg11: memref<1x128xf32, #tpu.memory_space<vmem>>, %arg12: memref<1x128xf32, #tpu.memory_space<vmem>>, %arg13: memref<128x128xbf16, #tpu.memory_space<vmem>>, %arg14: memref<1x128xf32, #tpu.memory_space<vmem>>, %arg15: memref<8x128xf32, #tpu.memory_space<vmem>>) attributes {dimension_semantics = [], scalar_prefetch = 0 : i64, scratch_operands = 0 : i64, tpu.core_type = #tpu.core_type<tc>} {
    %c0 = arith.constant 0 : index
    %c0_0 = arith.constant 0 : index
    %0 = vector.load %arg0[%c0, %c0_0] : memref<8x784xbf16, #tpu.memory_space<vmem>>, vector<8x784xbf16>
    %c0_1 = arith.constant 0 : index
    %c0_2 = arith.constant 0 : index
    %1 = vector.load %arg1[%c0_1, %c0_2] : memref<784x512xbf16, #tpu.memory_space<vmem>>, vector<784x512xbf16>
    %cst = arith.constant dense<0.000000e+00> : vector<8x512xf32>
    %2 = tpu.matmul %0, %1, %cst {dimension_numbers = #tpu.dot_dimension_numbers<[1], [0], [0], [1], [0, 0, 1, 1], [], []>} : vector<8x784xbf16>, vector<784x512xbf16>, vector<8x512xf32> -> vector<8x512xf32>
    %c0_3 = arith.constant 0 : index
    %c0_4 = arith.constant 0 : index
    %3 = vector.load %arg2[%c0_3, %c0_4] : memref<1x512xf32, #tpu.memory_space<vmem>>, vector<1x512xf32>
    %c0_5 = arith.constant 0 : index
    %c0_6 = arith.constant 0 : index
    %4 = vector.load %arg3[%c0_5, %c0_6] : memref<1x512xf32, #tpu.memory_space<vmem>>, vector<1x512xf32>
    %cst_7 = arith.constant dense<0.000000e+00> : vector<512xf32>
    %5 = vector.multi_reduction <add>, %2, %cst_7 [0] : vector<8x512xf32> to vector<512xf32>
    %6 = vector.shape_cast %5 : vector<512xf32> to vector<1x512xf32>
    %cst_8 = arith.constant 8.000000e+00 : f32
    %7 = vector.broadcast %cst_8 : f32 to vector<1x512xf32>
    %8 = arith.divf %6, %7 : vector<1x512xf32>
    %9 = arith.mulf %2, %2 : vector<8x512xf32>
    %cst_9 = arith.constant dense<0.000000e+00> : vector<512xf32>
    %10 = vector.multi_reduction <add>, %9, %cst_9 [0] : vector<8x512xf32> to vector<512xf32>
    %11 = vector.shape_cast %10 : vector<512xf32> to vector<1x512xf32>
    %cst_10 = arith.constant 8.000000e+00 : f32
    %12 = vector.broadcast %cst_10 : f32 to vector<1x512xf32>
    %13 = arith.divf %11, %12 : vector<1x512xf32>
    %14 = arith.mulf %8, %8 : vector<1x512xf32>
    %15 = arith.subf %13, %14 : vector<1x512xf32>
    %cst_11 = arith.constant 9.99999974E-6 : f32
    %16 = vector.broadcast %cst_11 : f32 to vector<1x512xf32>
    %17 = arith.addf %15, %16 : vector<1x512xf32>
    %18 = math.rsqrt %17 : vector<1x512xf32>
    %19 = arith.mulf %18, %3 : vector<1x512xf32>
    %20 = arith.mulf %8, %19 : vector<1x512xf32>
    %21 = arith.subf %4, %20 : vector<1x512xf32>
    %22 = vector.broadcast %19 : vector<1x512xf32> to vector<8x512xf32>
    %23 = arith.mulf %2, %22 : vector<8x512xf32>
    %24 = vector.broadcast %21 : vector<1x512xf32> to vector<8x512xf32>
    %25 = arith.addf %23, %24 : vector<8x512xf32>
    %cst_12 = arith.constant 0.000000e+00 : f32
    %26 = vector.broadcast %cst_12 : f32 to vector<8x512xf32>
    %27 = arith.maximumf %25, %26 : vector<8x512xf32>
    %28 = arith.truncf %27 : vector<8x512xf32> to vector<8x512xbf16>
    %c0_13 = arith.constant 0 : index
    %c0_14 = arith.constant 0 : index
    %29 = vector.load %arg4[%c0_13, %c0_14] : memref<512x256xbf16, #tpu.memory_space<vmem>>, vector<512x256xbf16>
    %cst_15 = arith.constant dense<0.000000e+00> : vector<8x256xf32>
    %30 = tpu.matmul %28, %29, %cst_15 {dimension_numbers = #tpu.dot_dimension_numbers<[1], [0], [0], [1], [0, 0, 1, 1], [], []>} : vector<8x512xbf16>, vector<512x256xbf16>, vector<8x256xf32> -> vector<8x256xf32>
    %c0_16 = arith.constant 0 : index
    %c0_17 = arith.constant 0 : index
    %31 = vector.load %arg5[%c0_16, %c0_17] : memref<1x256xf32, #tpu.memory_space<vmem>>, vector<1x256xf32>
    %c0_18 = arith.constant 0 : index
    %c0_19 = arith.constant 0 : index
    %32 = vector.load %arg6[%c0_18, %c0_19] : memref<1x256xf32, #tpu.memory_space<vmem>>, vector<1x256xf32>
    %cst_20 = arith.constant dense<0.000000e+00> : vector<256xf32>
    %33 = vector.multi_reduction <add>, %30, %cst_20 [0] : vector<8x256xf32> to vector<256xf32>
    %34 = vector.shape_cast %33 : vector<256xf32> to vector<1x256xf32>
    %cst_21 = arith.constant 8.000000e+00 : f32
    %35 = vector.broadcast %cst_21 : f32 to vector<1x256xf32>
    %36 = arith.divf %34, %35 : vector<1x256xf32>
    %37 = arith.mulf %30, %30 : vector<8x256xf32>
    %cst_22 = arith.constant dense<0.000000e+00> : vector<256xf32>
    %38 = vector.multi_reduction <add>, %37, %cst_22 [0] : vector<8x256xf32> to vector<256xf32>
    %39 = vector.shape_cast %38 : vector<256xf32> to vector<1x256xf32>
    %cst_23 = arith.constant 8.000000e+00 : f32
    %40 = vector.broadcast %cst_23 : f32 to vector<1x256xf32>
    %41 = arith.divf %39, %40 : vector<1x256xf32>
    %42 = arith.mulf %36, %36 : vector<1x256xf32>
    %43 = arith.subf %41, %42 : vector<1x256xf32>
    %cst_24 = arith.constant 9.99999974E-6 : f32
    %44 = vector.broadcast %cst_24 : f32 to vector<1x256xf32>
    %45 = arith.addf %43, %44 : vector<1x256xf32>
    %46 = math.rsqrt %45 : vector<1x256xf32>
    %47 = arith.mulf %46, %31 : vector<1x256xf32>
    %48 = arith.mulf %36, %47 : vector<1x256xf32>
    %49 = arith.subf %32, %48 : vector<1x256xf32>
    %50 = vector.broadcast %47 : vector<1x256xf32> to vector<8x256xf32>
    %51 = arith.mulf %30, %50 : vector<8x256xf32>
    %52 = vector.broadcast %49 : vector<1x256xf32> to vector<8x256xf32>
    %53 = arith.addf %51, %52 : vector<8x256xf32>
    %cst_25 = arith.constant 0.000000e+00 : f32
    %54 = vector.broadcast %cst_25 : f32 to vector<8x256xf32>
    %55 = arith.maximumf %53, %54 : vector<8x256xf32>
    %56 = arith.truncf %55 : vector<8x256xf32> to vector<8x256xbf16>
    %c0_26 = arith.constant 0 : index
    %c0_27 = arith.constant 0 : index
    %57 = vector.load %arg7[%c0_26, %c0_27] : memref<256x128xbf16, #tpu.memory_space<vmem>>, vector<256x128xbf16>
    %cst_28 = arith.constant dense<0.000000e+00> : vector<8x128xf32>
    %58 = tpu.matmul %56, %57, %cst_28 {dimension_numbers = #tpu.dot_dimension_numbers<[1], [0], [0], [1], [0, 0, 1, 1], [], []>} : vector<8x256xbf16>, vector<256x128xbf16>, vector<8x128xf32> -> vector<8x128xf32>
    %c0_29 = arith.constant 0 : index
    %c0_30 = arith.constant 0 : index
    %59 = vector.load %arg8[%c0_29, %c0_30] : memref<1x128xf32, #tpu.memory_space<vmem>>, vector<1x128xf32>
    %c0_31 = arith.constant 0 : index
    %c0_32 = arith.constant 0 : index
    %60 = vector.load %arg9[%c0_31, %c0_32] : memref<1x128xf32, #tpu.memory_space<vmem>>, vector<1x128xf32>
    %cst_33 = arith.constant dense<0.000000e+00> : vector<128xf32>
    %61 = vector.multi_reduction <add>, %58, %cst_33 [0] : vector<8x128xf32> to vector<128xf32>
    %62 = vector.shape_cast %61 : vector<128xf32> to vector<1x128xf32>
    %cst_34 = arith.constant 8.000000e+00 : f32
    %63 = vector.broadcast %cst_34 : f32 to vector<1x128xf32>
    %64 = arith.divf %62, %63 : vector<1x128xf32>
    %65 = arith.mulf %58, %58 : vector<8x128xf32>
    %cst_35 = arith.constant dense<0.000000e+00> : vector<128xf32>
    %66 = vector.multi_reduction <add>, %65, %cst_35 [0] : vector<8x128xf32> to vector<128xf32>
    %67 = vector.shape_cast %66 : vector<128xf32> to vector<1x128xf32>
    %cst_36 = arith.constant 8.000000e+00 : f32
    %68 = vector.broadcast %cst_36 : f32 to vector<1x128xf32>
    %69 = arith.divf %67, %68 : vector<1x128xf32>
    %70 = arith.mulf %64, %64 : vector<1x128xf32>
    %71 = arith.subf %69, %70 : vector<1x128xf32>
    %cst_37 = arith.constant 9.99999974E-6 : f32
    %72 = vector.broadcast %cst_37 : f32 to vector<1x128xf32>
    %73 = arith.addf %71, %72 : vector<1x128xf32>
    %74 = math.rsqrt %73 : vector<1x128xf32>
    %75 = arith.mulf %74, %59 : vector<1x128xf32>
    %76 = arith.mulf %64, %75 : vector<1x128xf32>
    %77 = arith.subf %60, %76 : vector<1x128xf32>
    %78 = vector.broadcast %75 : vector<1x128xf32> to vector<8x128xf32>
    %79 = arith.mulf %58, %78 : vector<8x128xf32>
    %80 = vector.broadcast %77 : vector<1x128xf32> to vector<8x128xf32>
    %81 = arith.addf %79, %80 : vector<8x128xf32>
    %cst_38 = arith.constant 0.000000e+00 : f32
    %82 = vector.broadcast %cst_38 : f32 to vector<8x128xf32>
    %83 = arith.maximumf %81, %82 : vector<8x128xf32>
    %84 = arith.truncf %83 : vector<8x128xf32> to vector<8x128xbf16>
    %c0_39 = arith.constant 0 : index
    %c0_40 = arith.constant 0 : index
    %85 = vector.load %arg10[%c0_39, %c0_40] : memref<128x128xbf16, #tpu.memory_space<vmem>>, vector<128x128xbf16>
    %cst_41 = arith.constant dense<0.000000e+00> : vector<8x128xf32>
    %86 = tpu.matmul %84, %85, %cst_41 {dimension_numbers = #tpu.dot_dimension_numbers<[1], [0], [0], [1], [0, 0, 1, 1], [], []>} : vector<8x128xbf16>, vector<128x128xbf16>, vector<8x128xf32> -> vector<8x128xf32>
    %c0_42 = arith.constant 0 : index
    %c0_43 = arith.constant 0 : index
    %87 = vector.load %arg11[%c0_42, %c0_43] : memref<1x128xf32, #tpu.memory_space<vmem>>, vector<1x128xf32>
    %c0_44 = arith.constant 0 : index
    %c0_45 = arith.constant 0 : index
    %88 = vector.load %arg12[%c0_44, %c0_45] : memref<1x128xf32, #tpu.memory_space<vmem>>, vector<1x128xf32>
    %cst_46 = arith.constant dense<0.000000e+00> : vector<128xf32>
    %89 = vector.multi_reduction <add>, %86, %cst_46 [0] : vector<8x128xf32> to vector<128xf32>
    %90 = vector.shape_cast %89 : vector<128xf32> to vector<1x128xf32>
    %cst_47 = arith.constant 8.000000e+00 : f32
    %91 = vector.broadcast %cst_47 : f32 to vector<1x128xf32>
    %92 = arith.divf %90, %91 : vector<1x128xf32>
    %93 = arith.mulf %86, %86 : vector<8x128xf32>
    %cst_48 = arith.constant dense<0.000000e+00> : vector<128xf32>
    %94 = vector.multi_reduction <add>, %93, %cst_48 [0] : vector<8x128xf32> to vector<128xf32>
    %95 = vector.shape_cast %94 : vector<128xf32> to vector<1x128xf32>
    %cst_49 = arith.constant 8.000000e+00 : f32
    %96 = vector.broadcast %cst_49 : f32 to vector<1x128xf32>
    %97 = arith.divf %95, %96 : vector<1x128xf32>
    %98 = arith.mulf %92, %92 : vector<1x128xf32>
    %99 = arith.subf %97, %98 : vector<1x128xf32>
    %cst_50 = arith.constant 9.99999974E-6 : f32
    %100 = vector.broadcast %cst_50 : f32 to vector<1x128xf32>
    %101 = arith.addf %99, %100 : vector<1x128xf32>
    %102 = math.rsqrt %101 : vector<1x128xf32>
    %103 = arith.mulf %102, %87 : vector<1x128xf32>
    %104 = arith.mulf %92, %103 : vector<1x128xf32>
    %105 = arith.subf %88, %104 : vector<1x128xf32>
    %106 = vector.broadcast %103 : vector<1x128xf32> to vector<8x128xf32>
    %107 = arith.mulf %86, %106 : vector<8x128xf32>
    %108 = vector.broadcast %105 : vector<1x128xf32> to vector<8x128xf32>
    %109 = arith.addf %107, %108 : vector<8x128xf32>
    %cst_51 = arith.constant 0.000000e+00 : f32
    %110 = vector.broadcast %cst_51 : f32 to vector<8x128xf32>
    %111 = arith.maximumf %109, %110 : vector<8x128xf32>
    %112 = arith.truncf %111 : vector<8x128xf32> to vector<8x128xbf16>
    %c0_52 = arith.constant 0 : index
    %c0_53 = arith.constant 0 : index
    %113 = vector.load %arg13[%c0_52, %c0_53] : memref<128x128xbf16, #tpu.memory_space<vmem>>, vector<128x128xbf16>
    %cst_54 = arith.constant dense<0.000000e+00> : vector<8x128xf32>
    %114 = tpu.matmul %112, %113, %cst_54 {dimension_numbers = #tpu.dot_dimension_numbers<[1], [0], [0], [1], [0, 0, 1, 1], [], []>} : vector<8x128xbf16>, vector<128x128xbf16>, vector<8x128xf32> -> vector<8x128xf32>
    %c0_55 = arith.constant 0 : index
    %c0_56 = arith.constant 0 : index
    %115 = vector.load %arg14[%c0_55, %c0_56] : memref<1x128xf32, #tpu.memory_space<vmem>>, vector<1x128xf32>
    %116 = vector.broadcast %115 : vector<1x128xf32> to vector<8x128xf32>
    %117 = arith.addf %114, %116 : vector<8x128xf32>
    %cst_57 = arith.constant dense<0xFF800000> : vector<8xf32>
    %118 = vector.multi_reduction <maximumf>, %117, %cst_57 [1] : vector<8x128xf32> to vector<8xf32>
    %119 = vector.shape_cast %118 : vector<8xf32> to vector<8x1xf32>
    %120 = vector.broadcast %119 : vector<8x1xf32> to vector<8x128xf32>
    %121 = arith.subf %117, %120 : vector<8x128xf32>
    %122 = math.exp %121 : vector<8x128xf32>
    %cst_58 = arith.constant dense<0.000000e+00> : vector<8xf32>
    %123 = vector.multi_reduction <add>, %122, %cst_58 [1] : vector<8x128xf32> to vector<8xf32>
    %124 = vector.shape_cast %123 : vector<8xf32> to vector<8x1xf32>
    %125 = math.log %124 : vector<8x1xf32>
    %126 = vector.broadcast %125 : vector<8x1xf32> to vector<8x128xf32>
    %127 = arith.subf %121, %126 : vector<8x128xf32>
    %c0_59 = arith.constant 0 : index
    %c0_60 = arith.constant 0 : index
    %128 = vector.load %arg15[%c0_59, %c0_60] : memref<8x128xf32, #tpu.memory_space<vmem>>, vector<8x128xf32>
    tpu.vector_store %arg15[%c0_59, %c0_60], %127 {strides = array<i32>} : memref<8x128xf32, #tpu.memory_space<vmem>>, vector<8x128xf32>,
    return
  }
}

</mosaic_0001>

<bundles_post_ra>
// kernel: mlp_forward.1
= control target key start
LH: loop header
LB: loop body
LE: loop exit
PB: predicated region body
PF: predicated region fallthrough
CT: control target
= control target key end

     0   :  { %20 = vsyncpa [#allocation3], 0  ;;  %s4399_s0 = inlined_call_operand.vmem [shape: bf16[8,784], index: 0, kind: input, shape index: {}]   ;;  %s4400_s1 = inlined_call_operand.hbm [shape: bf16[784,512], index: 1, kind: input, shape index: {}]   ;;  %s4401_s2 = inlined_call_operand.vmem [shape: f32[1,512], index: 2, kind: input, shape index: {}]   ;;  %s4402_s3 = inlined_call_operand.vmem [shape: f32[1,512], index: 3, kind: input, shape index: {}]   ;;  %s4403_s4 = inlined_call_operand.vmem [shape: bf16[512,256], index: 4, kind: input, shape index: {}]   ;;  %s4404_s5 = inlined_call_operand.vmem [shape: f32[1,256], index: 5, kind: input, shape index: {}]   ;;  %s4405_s6 = inlined_call_operand.vmem [shape: f32[1,256], index: 6, kind: input, shape index: {}]   ;;  %s4406_s7 = inlined_call_operand.hbm [shape: bf16[256,128], index: 7, kind: input, shape index: {}]   ;;  %s4407_s8 = inlined_call_operand.vmem [shape: f32[1,128], index: 8, kind: input, shape index: {}]   ;;  %s4408_s9 = inlined_call_operand.vmem [shape: f32[1,128], index: 9, kind: input, shape index: {}]   ;;  %s4409_s10 = inlined_call_operand.hbm [shape: bf16[128,128], index: 10, kind: input, shape index: {}]   ;;  %s4410_s11 = inlined_call_operand.vmem [shape: f32[1,128], index: 11, kind: input, shape index: {}]   ;;  %s4411_s12 = inlined_call_operand.vmem [shape: f32[1,128], index: 12, kind: input, shape index: {}]   ;;  %s4412_s13 = inlined_call_operand.hbm [shape: bf16[128,128], index: 13, kind: input, shape index: {}]   ;;  %s4413_s14 = inlined_call_operand.vmem [shape: f32[1,128], index: 14, kind: input, shape index: {}]   ;;  %s4414_s15 = inlined_call_operand.hbm [shape: f32[8,128], index: 15, kind: output, shape index: {}]  }
   0x1   :  { %21 = vsyncpa [#allocation6], 0 }
   0x2   :  { %22 = vsyncpa [#allocation9], 0 }
   0x3   :  { %23 = vsyncpa [#allocation4], 0  ;;  %s3877_s18 = smov [#allocation5]   ;;  %s3759_s22 = scalar_lea.hbm %s4406_s7, 2048 }
   0x4   :  { %s53_s19 = sshll.u32 %s3877_s18, 4  ;;  %p3760_p0 = scmp.ne.s32.totalorder %s4406_s7, %s3759_s22  ;;  %s54_s19 = int_to_ptr.vmem [resolvable:$true] %s53_s19 }
   0x5   :  { %p3763_p1 = scmp.lt.u32.totalorder %s3759_s22, %s4406_s7 }
   0x7   :  { %p3765_p2 = pnand %p3763_p1, %p3760_p0 }
   0x9   :  { %3768 = shalt.err (!%p3765_p2)
}
   0xa   :  { %s3769_s27 = scalar_lea.vmem %s54_s19, 2048  ;;  %p3774_p4 = scmp.lt.s32.totalorder %s54_s19, %s54_s19 }
   0xb   :  { %p3770_p3 = scmp.ne.s32.totalorder %s54_s19, %s3769_s27  ;;  %p3775_p5 = scmp.lt.s32.totalorder %s3769_s27, %s3769_s27 }
   0xd   :  { %p3776_p6 = por %p3775_p5, %p3774_p4 }
   0xf   :  { %p3777_p7 = pnand %p3776_p6, %p3770_p3 }
  0x11   :  { %3780 = shalt.err (!%p3777_p7)
}
  0x12   :  { %s4415_s28 = smov 64   ;;  %s4417_s29 = smov 4  }
  0x13   :  { %59 = dma.hbm_to_vmem [thread:$0]  %s4406_s7, 2048, %s54_s19, [#allocation6], %s4415_s28, %s4415_s28, %s4417_s29  }
  0x14   :  { %s3880_s17 = smov [#allocation2]   ;;  %s3781_s22 = scalar_lea.hbm %s4400_s1, 25088 }
  0x15   :  { %s31_s18 = sshll.u32 %s3880_s17, 4  ;;  %p3782_p8 = scmp.ne.s32.totalorder %s4400_s1, %s3781_s22  ;;  %s32_s18 = int_to_ptr.vmem [resolvable:$true] %s31_s18 }
  0x16   :  { %p3785_p9 = scmp.lt.u32.totalorder %s3781_s22, %s4400_s1 }
  0x18   :  { %p3787_p10 = pnand %p3785_p9, %p3782_p8 }
  0x1a   :  { %3790 = shalt.err (!%p3787_p10)
}
  0x1b   :  { %s3791_s27 = scalar_lea.vmem %s32_s18, 25088  ;;  %p3796_p12 = scmp.lt.s32.totalorder %s32_s18, %s32_s18 }
  0x1c   :  { %p3792_p11 = scmp.ne.s32.totalorder %s32_s18, %s3791_s27  ;;  %p3797_p13 = scmp.lt.s32.totalorder %s3791_s27, %s3791_s27 }
  0x1e   :  { %p3798_p0 = por %p3797_p13, %p3796_p12 }
  0x20   :  { %p3799_p1 = pnand %p3798_p0, %p3792_p11 }
  0x22   :  { %3802 = shalt.err (!%p3799_p1)
}
  0x23   :  { %s3881_s7 = smov 256   ;;  %s3882_s19 = smov 16  }
  0x24   :  { %37 = dma.hbm_to_vmem [thread:$0]  %s4400_s1, 25088, %s32_s18, [#allocation3], %s3881_s7, %s3881_s7, %s3882_s19  }
  0x25   :  { %s3883_s17 = smov [#allocation7]   ;;  %s3884_s21 = smov [#allocation8]  }
  0x26   :  { %s69_s20 = sshll.u32 %s3883_s17, 4  ;;  %s85_s23 = sshll.u32 %s3884_s21, 4  ;;  %s70_s20 = int_to_ptr.vmem [resolvable:$true] %s69_s20  ;;  %s3997_s23 = int_to_ptr.vmem [resolvable:$true] %s85_s23 }
  0x27   :  { %s3803_s25 = scalar_lea.hbm %s4409_s10, 1024 }
  0x28   :  { %p3804_p2 = scmp.ne.s32.totalorder %s4409_s10, %s3803_s25  ;;  %p3807_p3 = scmp.lt.u32.totalorder %s3803_s25, %s4409_s10 }
  0x2a   :  { %p3809_p4 = pnand %p3807_p3, %p3804_p2 }
  0x2c   :  { %3812 = shalt.err (!%p3809_p4)
}
  0x2d   :  { %s3813_s1 = scalar_lea.vmem %s70_s20, 1024  ;;  %p3818_p6 = scmp.lt.s32.totalorder %s70_s20, %s70_s20 }
  0x2e   :  { %p3814_p5 = scmp.ne.s32.totalorder %s70_s20, %s3813_s1  ;;  %p3819_p7 = scmp.lt.s32.totalorder %s3813_s1, %s3813_s1 }
  0x30   :  { %p3820_p8 = por %p3819_p7, %p3818_p6 }
  0x32   :  { %p3821_p9 = pnand %p3820_p8, %p3814_p5 }
  0x34   :  { %3824 = shalt.err (!%p3821_p9)
}
  0x35   :  { %s4419_s18 = smov 4   ;;  %s4420_s7 = smov 64  }
  0x36   :  { %75 = dma.hbm_to_vmem [thread:$0]  %s4409_s10, 1024, %s70_s20, [#allocation6], %s4420_s7, %s4420_s7, %s4419_s18  }
  0x37   :  { %s3825_s28 = scalar_lea.hbm %s4412_s13, 1024 }
  0x38   :  { %p3826_p10 = scmp.ne.s32.totalorder %s4412_s13, %s3825_s28  ;;  %p3829_p11 = scmp.lt.u32.totalorder %s3825_s28, %s4412_s13 }
  0x3a   :  { %p3831_p12 = pnand %p3829_p11, %p3826_p10 }
  0x3c   :  { %3834 = shalt.err (!%p3831_p12)
}
  0x3d   :  { %s3835_s25 = scalar_lea.vmem %s3997_s23, 1024  ;;  %p3840_p0 = scmp.lt.s32.totalorder %s3997_s23, %s3997_s23 }
  0x3e   :  { %p3836_p13 = scmp.ne.s32.totalorder %s3997_s23, %s3835_s25  ;;  %p3841_p1 = scmp.lt.s32.totalorder %s3835_s25, %s3835_s25 }
  0x40   :  { %p3842_p2 = por %p3841_p1, %p3840_p0 }
  0x42   :  { %p3843_p3 = pnand %p3842_p2, %p3836_p13 }
  0x44   :  { %3846 = shalt.err (!%p3843_p3)
}
  0x45   :  { %91 = dma.hbm_to_vmem [thread:$0]  %s4412_s13, 1024, %s3997_s23, [#allocation9], %s4420_s7, %s4420_s7, %s4419_s18  }
  0x46   :  { %3869 = dma.done.wait [#allocation3], 25088  }
  0x47   :  { %3870 = vsyncadd [#allocation3], 4294942208 }
  0x48   :  { %3871 = dma.done.wait [#allocation6], 3072  }
  0x49   :  { %3872 = vsyncadd [#allocation6], 4294964224 }
  0x4a   :  { %3873 = dma.done.wait [#allocation9], 1024  }
  0x4b   :  { %3874 = vsyncadd [#allocation9], 4294966272  ;;  %v3885_v0 = vmov 0   ;;  %v3309_v1 = vld [vmem:[#allocation2 + $0x4] ss:$16 sps:$4 sm:$0xff]   ;;  %vm1311_vm0 = vcmask 130048  }
  0x4c   :  { %1470 = vmatprep.mubr.bf16.mxu1 %v3885_v0  ;;  %v3311_v2 = vld [vmem:[#allocation2 + $0x604] ss:$16 sps:$4 sm:$0xff]   ;;  %1315 = vmatprep.subr.bf16.mxu0 %v3309_v1  ;;  %v3313_v3 = vld [vmem:[#allocation2] ss:$16 sps:$4 sm:$0xff]   ;;  %v3317_v6 = vld [vmem:[%s4399_s0 + $0x18] ss:$0 sps:$4 sm:$0xff]  }
  0x4d   :  { %v3314_v4 = vld [vmem:[#allocation2 + $0x600] ss:$16 sps:$4 sm:$0xff]   ;;  %1438 = vmatprep.subr.bf16.mxu1 %v3311_v2  ;;  %v3315_v5 = vld [vmem:[#allocation2 + $0x24] ss:$16 sps:$4 sm:$0xff]   ;;  %1316 = vmatpush1.bf16.msra.mxu0 %v3313_v3  ;;  %v3318_v7 = vld [vmem:[#allocation2 + $0x8] ss:$16 sps:$4 sm:$0xff]  }
  0x4e   :  { %1439 = vmatpush1.bf16.msra.mxu1 %v3314_v4  ;;  %1317 = vmatprep.subr.bf16.mxu0 %v3315_v5  ;;  %v3320_v8 = vld [vmem:[#allocation2 + $0xc] ss:$16 sps:$4 sm:$0xff]   ;;  %v3321_v9 = vld [vmem:[#allocation2 + $0x20] ss:$16 sps:$4 sm:$0xff]   ;;  %v3322_v10 = vld [vmem:[#allocation2 + $0x44] ss:$16 sps:$4 sm:$0xff]  }
  0x4f   :  { %1479 = vmatprep.subr.bf16.mxu1 %v3320_v8  ;;  %v3324_v11 = vld [vmem:[#allocation2 + $0x28] ss:$16 sps:$4 sm:$0xff]   ;;  %v3326_v12 = vld [vmem:[#allocation2 + $0x2c] ss:$16 sps:$4 sm:$0xff]   ;;  %v3327_v13 = vld [vmem:[#allocation2 + $0x40] ss:$16 sps:$4 sm:$0xff]  }
  0x50   :  { %v3328_v14 = vld [vmem:[#allocation2 + $0x64] ss:$16 sps:$4 sm:$0xff]   ;;  %v3332_v15 = vld [vmem:[#allocation2 + $0x4c] ss:$16 sps:$4 sm:$0xff]   ;;  %v3330_v16 = vld [vmem:[#allocation2 + $0x48] ss:$16 sps:$4 sm:$0xff]  }
  0x51   :  { %3091 = vmatmul.mubr.msk.bf16.vlgmr.msra.gmra.mrb[0].mxu1 %vm1311_vm0, %v3317_v6  ;;  %1318 = vmatpush1.bf16.msra.mxu0 %v3321_v9  ;;  %v3333_v17 = vld [vmem:[#allocation2 + $0x60] ss:$16 sps:$4 sm:$0xff]   ;;  %v3334_v18 = vld [vmem:[#allocation2 + $0x84] ss:$16 sps:$4 sm:$0xff]   ;;  %v3338_v19 = vld [vmem:[#allocation2 + $0x6c] ss:$16 sps:$4 sm:$0xff]  }
  0x52   :  { %1480 = vmatpush1.bf16.msra.mxu1 %v3318_v7  ;;  %1319 = vmatprep.subr.bf16.mxu0 %v3322_v10  ;;  %v3336_v20 = vld [vmem:[#allocation2 + $0x68] ss:$16 sps:$4 sm:$0xff]   ;;  %v3339_v21 = vld [vmem:[#allocation2 + $0x80] ss:$16 sps:$4 sm:$0xff]   ;;  %v3340_v22 = vld [vmem:[#allocation2 + $0xa4] ss:$16 sps:$4 sm:$0xff]  }
  0x53   :  { %1481 = vmatprep.subr.bf16.mxu1 %v3326_v12  ;;  %v3344_v23 = vld [vmem:[#allocation2 + $0x8c] ss:$16 sps:$4 sm:$0xff]   ;;  %v3342_v24 = vld [vmem:[#allocation2 + $0x88] ss:$16 sps:$4 sm:$0xff]   ;;  %v3345_v25 = vld [vmem:[#allocation2 + $0xa0] ss:$16 sps:$4 sm:$0xff]  }
  0x54   :  { %v3346_v26 = vld [vmem:[#allocation2 + $0xc4] ss:$16 sps:$4 sm:$0xff]   ;;  %v3350_v27 = vld [vmem:[#allocation2 + $0xac] ss:$16 sps:$4 sm:$0xff]   ;;  %v3348_v28 = vld [vmem:[#allocation2 + $0xa8] ss:$16 sps:$4 sm:$0xff]  }
  0x55   :  { %1320 = vmatpush1.bf16.msra.mxu0 %v3327_v13  ;;  %v3351_v29 = vld [vmem:[#allocation2 + $0xc0] ss:$16 sps:$4 sm:$0xff]   ;;  %v3352_v30 = vld [vmem:[#allocation2 + $0xe4] ss:$16 sps:$4 sm:$0xff]   ;;  %v3356_v31 = vld [vmem:[#allocation2 + $0xcc] ss:$16 sps:$4 sm:$0xff]  }
  0x56   :  { %1482 = vmatpush1.bf16.msra.mxu1 %v3324_v11  ;;  %1321 = vmatprep.subr.bf16.mxu0 %v3328_v14  ;;  %v3354_v32 = vld [vmem:[#allocation2 + $0xc8] ss:$16 sps:$4 sm:$0xff]   ;;  %v3357_v33 = vld [vmem:[#allocation2 + $0xe0] ss:$16 sps:$4 sm:$0xff]   ;;  %v3358_v34 = vld [vmem:[#allocation2 + $0x104] ss:$16 sps:$4 sm:$0xff]  }
  0x57   :  { %1483 = vmatprep.subr.bf16.mxu1 %v3332_v15  ;;  %v3362_v35 = vld [vmem:[#allocation2 + $0xec] ss:$16 sps:$4 sm:$0xff]   ;;  %v3360_v36 = vld [vmem:[#allocation2 + $0xe8] ss:$16 sps:$4 sm:$0xff]   ;;  %v3363_v37 = vld [vmem:[#allocation2 + $0x100] ss:$16 sps:$4 sm:$0xff]  }
  0x58   :  { %v3364_v38 = vld [vmem:[#allocation2 + $0x124] ss:$16 sps:$4 sm:$0xff]   ;;  %v3368_v39 = vld [vmem:[#allocation2 + $0x10c] ss:$16 sps:$4 sm:$0xff]   ;;  %v3366_v40 = vld [vmem:[#allocation2 + $0x108] ss:$16 sps:$4 sm:$0xff]  }
  0x59   :  { %1322 = vmatpush1.bf16.msra.mxu0 %v3333_v17  ;;  %v3369_v41 = vld [vmem:[#allocation2 + $0x120] ss:$16 sps:$4 sm:$0xff]   ;;  %v3370_v42 = vld [vmem:[#allocation2 + $0x144] ss:$16 sps:$4 sm:$0xff]   ;;  %v3374_v43 = vld [vmem:[#allocation2 + $0x12c] ss:$16 sps:$4 sm:$0xff]  }
  0x5a   :  { %1484 = vmatpush1.bf16.msra.mxu1 %v3330_v16  ;;  %1323 = vmatprep.subr.bf16.mxu0 %v3334_v18  ;;  %v3372_v44 = vld [vmem:[#allocation2 + $0x128] ss:$16 sps:$4 sm:$0xff]   ;;  %v3375_v45 = vld [vmem:[#allocation2 + $0x140] ss:$16 sps:$4 sm:$0xff]   ;;  %v3376_v46 = vld [vmem:[#allocation2 + $0x164] ss:$16 sps:$4 sm:$0xff]  }
  0x5b   :  { %1485 = vmatprep.subr.bf16.mxu1 %v3338_v19  ;;  %v3380_v47 = vld [vmem:[#allocation2 + $0x14c] ss:$16 sps:$4 sm:$0xff]   ;;  %v3378_v48 = vld [vmem:[#allocation2 + $0x148] ss:$16 sps:$4 sm:$0xff]   ;;  %v107_v49 = vld [vmem:[%s4399_s0] sm:$0xff]  ;;  %vm3888_vm1 = vmmov 0  }
  0x5c   :  { %v3381_v50 = vld [vmem:[#allocation2 + $0x160] ss:$16 sps:$4 sm:$0xff]   ;;  %v3382_v51 = vld [vmem:[#allocation2 + $0x184] ss:$16 sps:$4 sm:$0xff]   ;;  %v2889_v52 = vcombine.high %v107_v49, %v107_v49  ;;  %v3386_v53 = vld [vmem:[#allocation2 + $0x16c] ss:$16 sps:$4 sm:$0xff]   ;;  %v2888_v7 = vcombine.low %v107_v49, %v107_v49 }
  0x5d   :  { %1324 = vmatpush1.bf16.msra.mxu0 %v3339_v21  ;;  %v3384_v54 = vld [vmem:[#allocation2 + $0x168] ss:$16 sps:$4 sm:$0xff]   ;;  %v3387_v55 = vld [vmem:[#allocation2 + $0x180] ss:$16 sps:$4 sm:$0xff]   ;;  %v3388_v56 = vld [vmem:[#allocation2 + $0x1a4] ss:$16 sps:$4 sm:$0xff]  }
  0x5e   :  { %1486 = vmatpush1.bf16.msra.mxu1 %v3336_v20  ;;  %1325 = vmatprep.subr.bf16.mxu0 %v3340_v22  ;;  %v3392_v57 = vld [vmem:[#allocation2 + $0x18c] ss:$16 sps:$4 sm:$0xff]   ;;  %v3390_v58 = vld [vmem:[#allocation2 + $0x188] ss:$16 sps:$4 sm:$0xff]   ;;  %v3393_v59 = vld [vmem:[#allocation2 + $0x1a0] ss:$16 sps:$4 sm:$0xff]  }
  0x5f   :  { %1487 = vmatprep.subr.bf16.mxu1 %v3344_v23  ;;  %1347 = vmatprep.mubr.bf16.mxu0 %v2889_v52  ;;  %v3394_v60 = vld [vmem:[#allocation2 + $0x1c4] ss:$16 sps:$4 sm:$0xff]   ;;  %v3398_v61 = vld [vmem:[#allocation2 + $0x1ac] ss:$16 sps:$4 sm:$0xff]   ;;  %v3396_v62 = vld [vmem:[#allocation2 + $0x1a8] ss:$16 sps:$4 sm:$0xff]  }
  0x60   :  { %1511 = vmatprep.mubr.bf16.mxu1 %v2889_v52  ;;  %v3399_v63 = vld [vmem:[#allocation2 + $0x1c0] ss:$16 sps:$4 sm:$0xff]   ;;  %v3400_v1 = vld [vmem:[#allocation2 + $0x1e4] ss:$16 sps:$4 sm:$0xff]   ;;  %v3404_v2 = vld [vmem:[#allocation2 + $0x1cc] ss:$16 sps:$4 sm:$0xff]  }
  0x61   :  { %1326 = vmatpush1.bf16.msra.mxu0 %v3345_v25  ;;  %v3402_v3 = vld [vmem:[#allocation2 + $0x1c8] ss:$16 sps:$4 sm:$0xff]   ;;  %v3405_v4 = vld [vmem:[#allocation2 + $0x1e0] ss:$16 sps:$4 sm:$0xff]   ;;  %v3410_v5 = vld [vmem:[#allocation2 + $0x204] ss:$16 sps:$4 sm:$0xff]  }
  0x62   :  { %1488 = vmatpush1.bf16.msra.mxu1 %v3342_v24  ;;  %1327 = vmatprep.subr.bf16.mxu0 %v3346_v26  ;;  %v3413_v6 = vld [vmem:[#allocation2 + $0x1ec] ss:$16 sps:$4 sm:$0xff]   ;;  %v3408_v8 = vld [vmem:[#allocation2 + $0x200] ss:$16 sps:$4 sm:$0xff]   ;;  %v3411_v9 = vld [vmem:[#allocation2 + $0x1e8] ss:$16 sps:$4 sm:$0xff]  }
  0x63   :  { %1489 = vmatprep.subr.bf16.mxu1 %v3350_v27  ;;  %v3416_v10 = vld [vmem:[#allocation2 + $0x224] ss:$16 sps:$4 sm:$0xff]   ;;  %v3419_v11 = vld [vmem:[#allocation2 + $0x20c] ss:$16 sps:$4 sm:$0xff]   ;;  %v3414_v12 = vld [vmem:[#allocation2 + $0x220] ss:$16 sps:$4 sm:$0xff]  }
  0x64   :  { %v3417_v13 = vld [vmem:[#allocation2 + $0x208] ss:$16 sps:$4 sm:$0xff]   ;;  %v3422_v14 = vld [vmem:[#allocation2 + $0x244] ss:$16 sps:$4 sm:$0xff]   ;;  %v3425_v15 = vld [vmem:[#allocation2 + $0x22c] ss:$16 sps:$4 sm:$0xff]  }
  0x65   :  { %1328 = vmatpush1.bf16.msra.mxu0 %v3351_v29  ;;  %v3420_v16 = vld [vmem:[#allocation2 + $0x240] ss:$16 sps:$4 sm:$0xff]   ;;  %v3423_v17 = vld [vmem:[#allocation2 + $0x228] ss:$16 sps:$4 sm:$0xff]   ;;  %v3428_v18 = vld [vmem:[#allocation2 + $0x264] ss:$16 sps:$4 sm:$0xff]  }
  0x66   :  { %1490 = vmatpush1.bf16.msra.mxu1 %v3348_v28  ;;  %1329 = vmatprep.subr.bf16.mxu0 %v3352_v30  ;;  %v3431_v19 = vld [vmem:[#allocation2 + $0x24c] ss:$16 sps:$4 sm:$0xff]   ;;  %v3426_v20 = vld [vmem:[#allocation2 + $0x260] ss:$16 sps:$4 sm:$0xff]   ;;  %v3429_v21 = vld [vmem:[#allocation2 + $0x248] ss:$16 sps:$4 sm:$0xff]  }
  0x67   :  { %1491 = vmatprep.subr.bf16.mxu1 %v3356_v31  ;;  %v3434_v22 = vld [vmem:[#allocation2 + $0x284] ss:$16 sps:$4 sm:$0xff]   ;;  %v3437_v23 = vld [vmem:[#allocation2 + $0x26c] ss:$16 sps:$4 sm:$0xff]   ;;  %v3432_v24 = vld [vmem:[#allocation2 + $0x280] ss:$16 sps:$4 sm:$0xff]  }
  0x68   :  { %v3435_v25 = vld [vmem:[#allocation2 + $0x268] ss:$16 sps:$4 sm:$0xff]   ;;  %v3440_v26 = vld [vmem:[#allocation2 + $0x2a4] ss:$16 sps:$4 sm:$0xff]   ;;  %v3443_v27 = vld [vmem:[#allocation2 + $0x28c] ss:$16 sps:$4 sm:$0xff]  }
  0x69   :  { %1330 = vmatpush1.bf16.msra.mxu0 %v3357_v33  ;;  %v3438_v28 = vld [vmem:[#allocation2 + $0x2a0] ss:$16 sps:$4 sm:$0xff]   ;;  %v3441_v29 = vld [vmem:[#allocation2 + $0x288] ss:$16 sps:$4 sm:$0xff]   ;;  %v3446_v30 = vld [vmem:[#allocation2 + $0x2c4] ss:$16 sps:$4 sm:$0xff]  }
  0x6a   :  { %1492 = vmatpush1.bf16.msra.mxu1 %v3354_v32  ;;  %1331 = vmatprep.subr.bf16.mxu0 %v3358_v34  ;;  %v3449_v31 = vld [vmem:[#allocation2 + $0x2ac] ss:$16 sps:$4 sm:$0xff]   ;;  %v3444_v33 = vld [vmem:[#allocation2 + $0x2c0] ss:$16 sps:$4 sm:$0xff]   ;;  %v3447_v34 = vld [vmem:[#allocation2 + $0x2a8] ss:$16 sps:$4 sm:$0xff]  }
  0x6b   :  { %1493 = vmatprep.subr.bf16.mxu1 %v3362_v35  ;;  %v4045_v32 = vld [vmem:[%s4399_s0 + $0x8] sm:$0xff]  ;;  %v3476_v52 = vld [vmem:[#allocation2 + $0x364] ss:$16 sps:$4 sm:$0xff]  }
  0x6c   :  { %v2891_v35 = vcombine.high %v4045_v32, %v4045_v32  ;;  %v3473_v49 = vld [vmem:[#allocation2 + $0x32c] ss:$16 sps:$4 sm:$0xff]  }
  0x6d   :  { %1332 = vmatpush1.bf16.msra.mxu0 %v3363_v37  ;;  %v3455_v37 = vld [vmem:[#allocation2 + $0x2cc] ss:$16 sps:$4 sm:$0xff]  }
  0x6e   :  { %1494 = vmatpush1.bf16.msra.mxu1 %v3360_v36  ;;  %1333 = vmatprep.subr.bf16.mxu0 %v3364_v38  ;;  %v3452_v36 = vld [vmem:[#allocation2 + $0x2e4] ss:$16 sps:$4 sm:$0xff]   ;;  %v3450_v38 = vld [vmem:[#allocation2 + $0x2e0] ss:$16 sps:$4 sm:$0xff]  }
  0x6f   :  { %1495 = vmatprep.subr.bf16.mxu1 %v3368_v39  ;;  %v3453_v39 = vld [vmem:[#allocation2 + $0x2c8] ss:$16 sps:$4 sm:$0xff]  }
  0x71   :  { %1334 = vmatpush1.bf16.msra.mxu0 %v3369_v41  ;;  %v3461_v41 = vld [vmem:[#allocation2 + $0x2ec] ss:$16 sps:$4 sm:$0xff]  }
  0x72   :  { %1496 = vmatpush1.bf16.msra.mxu1 %v3366_v40  ;;  %1335 = vmatprep.subr.bf16.mxu0 %v3370_v42  ;;  %v3458_v40 = vld [vmem:[#allocation2 + $0x304] ss:$16 sps:$4 sm:$0xff]   ;;  %v3456_v42 = vld [vmem:[#allocation2 + $0x300] ss:$16 sps:$4 sm:$0xff]  }
  0x73   :  { %1497 = vmatprep.subr.bf16.mxu1 %v3374_v43  ;;  %v3459_v43 = vld [vmem:[#allocation2 + $0x2e8] ss:$16 sps:$4 sm:$0xff]  }
  0x75   :  { %1336 = vmatpush1.bf16.msra.mxu0 %v3375_v45  ;;  %v3467_v45 = vld [vmem:[#allocation2 + $0x30c] ss:$16 sps:$4 sm:$0xff]  }
  0x76   :  { %1498 = vmatpush1.bf16.msra.mxu1 %v3372_v44  ;;  %1337 = vmatprep.subr.bf16.mxu0 %v3376_v46  ;;  %v3464_v44 = vld [vmem:[#allocation2 + $0x324] ss:$16 sps:$4 sm:$0xff]   ;;  %v3462_v46 = vld [vmem:[#allocation2 + $0x320] ss:$16 sps:$4 sm:$0xff]  }
  0x77   :  { %1499 = vmatprep.subr.bf16.mxu1 %v3380_v47  ;;  %v3465_v47 = vld [vmem:[#allocation2 + $0x308] ss:$16 sps:$4 sm:$0xff]  }
  0x79   :  { %1338 = vmatpush1.bf16.msra.mxu0 %v3381_v50  ;;  %v3468_v50 = vld [vmem:[#allocation2 + $0x340] ss:$16 sps:$4 sm:$0xff]  }
  0x7a   :  { %1500 = vmatpush1.bf16.msra.mxu1 %v3378_v48  ;;  %1339 = vmatprep.subr.bf16.mxu0 %v3382_v51  ;;  %v3470_v48 = vld [vmem:[#allocation2 + $0x344] ss:$16 sps:$4 sm:$0xff]   ;;  %v3471_v51 = vld [vmem:[#allocation2 + $0x328] ss:$16 sps:$4 sm:$0xff]  }
  0x7b   :  { %1501 = vmatprep.subr.bf16.mxu1 %v3386_v53  ;;  %v3479_v53 = vld [vmem:[#allocation2 + $0x34c] ss:$16 sps:$4 sm:$0xff]  }
  0x7d   :  { %1340 = vmatpush1.bf16.msra.mxu0 %v3387_v55  ;;  %v3477_v55 = vld [vmem:[#allocation2 + $0x348] ss:$16 sps:$4 sm:$0xff]  }
  0x7e   :  { %1502 = vmatpush1.bf16.msra.mxu1 %v3384_v54  ;;  %1341 = vmatprep.subr.bf16.mxu0 %v3388_v56  ;;  %v3474_v54 = vld [vmem:[#allocation2 + $0x360] ss:$16 sps:$4 sm:$0xff]   ;;  %v3482_v56 = vld [vmem:[#allocation2 + $0x384] ss:$16 sps:$4 sm:$0xff]  }
  0x7f   :  { %1503 = vmatprep.subr.bf16.mxu1 %v3392_v57  ;;  %v3485_v57 = vld [vmem:[#allocation2 + $0x36c] ss:$16 sps:$4 sm:$0xff]  }
  0x81   :  { %1342 = vmatpush1.bf16.msra.mxu0 %v3393_v59  ;;  %v3483_v59 = vld [vmem:[#allocation2 + $0x368] ss:$16 sps:$4 sm:$0xff]  }
  0x82   :  { %1504 = vmatpush1.bf16.msra.mxu1 %v3390_v58  ;;  %1343 = vmatprep.subr.bf16.mxu0 %v3394_v60  ;;  %v3480_v58 = vld [vmem:[#allocation2 + $0x380] ss:$16 sps:$4 sm:$0xff]   ;;  %v3488_v60 = vld [vmem:[#allocation2 + $0x3a4] ss:$16 sps:$4 sm:$0xff]  }
  0x83   :  { %1505 = vmatprep.subr.bf16.mxu1 %v3398_v61  ;;  %v3491_v61 = vld [vmem:[#allocation2 + $0x38c] ss:$16 sps:$4 sm:$0xff]  }
  0x85   :  { %1344 = vmatpush1.bf16.msra.mxu0 %v3399_v63  ;;  %v3489_v63 = vld [vmem:[#allocation2 + $0x388] ss:$16 sps:$4 sm:$0xff]  }
  0x86   :  { %1506 = vmatpush1.bf16.msra.mxu1 %v3396_v62  ;;  %1345 = vmatprep.subr.bf16.mxu0 %v3400_v1  ;;  %v3486_v62 = vld [vmem:[#allocation2 + $0x3a0] ss:$16 sps:$4 sm:$0xff]   ;;  %v3494_v1 = vld [vmem:[#allocation2 + $0x3c4] ss:$16 sps:$4 sm:$0xff]  }
  0x87   :  { %1507 = vmatprep.subr.bf16.mxu1 %v3404_v2  ;;  %v3497_v2 = vld [vmem:[#allocation2 + $0x3ac] ss:$16 sps:$4 sm:$0xff]  }
  0x89   :  { %1346 = vmatpush1.bf16.msra.mxu0 %v3405_v4  ;;  %v3495_v4 = vld [vmem:[#allocation2 + $0x3a8] ss:$16 sps:$4 sm:$0xff]  }
  0x8a   :  { %1508 = vmatpush1.bf16.msra.mxu1 %v3402_v3  ;;  %1356 = vmatprep.subr.bf16.mxu0 %v3410_v5  ;;  %v3492_v3 = vld [vmem:[#allocation2 + $0x3c0] ss:$16 sps:$4 sm:$0xff]   ;;  %v3500_v5 = vld [vmem:[#allocation2 + $0x3e4] ss:$16 sps:$4 sm:$0xff]  }
  0x8b   :  { %1509 = vmatprep.subr.bf16.mxu1 %v3413_v6  ;;  %v3503_v6 = vld [vmem:[#allocation2 + $0x3cc] ss:$16 sps:$4 sm:$0xff]  }
  0x8c   :  { %1348 = vmatmul.mubr.bf16.vlgmr.msra.gmra.mrb[0].mxu0 %v2888_v7 }
  0x8d   :  { %1357 = vmatpush1.bf16.msra.mxu0 %v3408_v8  ;;  %1388 = vmatprep.mubr.bf16.mxu0 %v2891_v35  ;;  %v3501_v8 = vld [vmem:[#allocation2 + $0x3c8] ss:$16 sps:$4 sm:$0xff]  }
  0x8e   :  { %1510 = vmatpush1.bf16.msra.mxu1 %v3411_v9  ;;  %1358 = vmatprep.subr.bf16.mxu0 %v3416_v10  ;;  %v3508_v9 = vld [vmem:[#allocation2 + $0x404] ss:$16 sps:$4 sm:$0xff]   ;;  %v3511_v10 = vld [vmem:[#allocation2 + $0x3ec] ss:$16 sps:$4 sm:$0xff]  }
  0x8f   :  { %1520 = vmatprep.subr.bf16.mxu1 %v3419_v11  ;;  %v2890_v11 = vcombine.low %v4045_v32, %v4045_v32  ;;  %v3538_v32 = vld [vmem:[#allocation2 + $0x4a4] ss:$16 sps:$4 sm:$0xff]  }
  0x91   :  { %1512 = vmatmul.mubr.bf16.vlgmr.msra.gmra.mrb[4].mxu1 %v2888_v7  ;;  %1359 = vmatpush1.bf16.msra.mxu0 %v3414_v12  ;;  %v3498_v7 = vld [vmem:[#allocation2 + $0x3e0] ss:$16 sps:$4 sm:$0xff]  }
  0x92   :  { %1521 = vmatpush1.bf16.msra.mxu1 %v3417_v13  ;;  %1360 = vmatprep.subr.bf16.mxu0 %v3422_v14  ;;  %v3506_v12 = vld [vmem:[#allocation2 + $0x400] ss:$16 sps:$4 sm:$0xff]   ;;  %v3509_v13 = vld [vmem:[#allocation2 + $0x3e8] ss:$16 sps:$4 sm:$0xff]   ;;  %v3514_v14 = vld [vmem:[#allocation2 + $0x424] ss:$16 sps:$4 sm:$0xff]  }
  0x93   :  { %1522 = vmatprep.subr.bf16.mxu1 %v3425_v15  ;;  %1552 = vmatprep.mubr.bf16.mxu1 %v2891_v35  ;;  %v3517_v15 = vld [vmem:[#allocation2 + $0x40c] ss:$16 sps:$4 sm:$0xff]   ;;  %v3539_v35 = vld [vmem:[#allocation2 + $0x488] ss:$16 sps:$4 sm:$0xff]  }
  0x95   :  { %1361 = vmatpush1.bf16.msra.mxu0 %v3420_v16  ;;  %v4054_v16 = vld [vmem:[%s4399_s0 + $0x10] sm:$0xff] }
  0x96   :  { %1523 = vmatpush1.bf16.msra.mxu1 %v3423_v17  ;;  %1362 = vmatprep.subr.bf16.mxu0 %v3428_v18  ;;  %v3512_v17 = vld [vmem:[#allocation2 + $0x420] ss:$16 sps:$4 sm:$0xff]   ;;  %v3515_v18 = vld [vmem:[#allocation2 + $0x408] ss:$16 sps:$4 sm:$0xff]  }
  0x97   :  { %1524 = vmatprep.subr.bf16.mxu1 %v3431_v19  ;;  %v2893_v19 = vcombine.high %v4054_v16, %v4054_v16 }
  0x99   :  { %1363 = vmatpush1.bf16.msra.mxu0 %v3426_v20  ;;  %v3520_v20 = vld [vmem:[#allocation2 + $0x444] ss:$16 sps:$4 sm:$0xff]  }
  0x9a   :  { %1525 = vmatpush1.bf16.msra.mxu1 %v3429_v21  ;;  %1364 = vmatprep.subr.bf16.mxu0 %v3434_v22  ;;  %v3523_v21 = vld [vmem:[#allocation2 + $0x42c] ss:$16 sps:$4 sm:$0xff]   ;;  %v3518_v22 = vld [vmem:[#allocation2 + $0x440] ss:$16 sps:$4 sm:$0xff]  }
  0x9b   :  { %1526 = vmatprep.subr.bf16.mxu1 %v3437_v23  ;;  %v3521_v23 = vld [vmem:[#allocation2 + $0x428] ss:$16 sps:$4 sm:$0xff]  }
  0x9d   :  { %1365 = vmatpush1.bf16.msra.mxu0 %v3432_v24  ;;  %v3526_v24 = vld [vmem:[#allocation2 + $0x464] ss:$16 sps:$4 sm:$0xff]  }
  0x9e   :  { %1527 = vmatpush1.bf16.msra.mxu1 %v3435_v25  ;;  %1366 = vmatprep.subr.bf16.mxu0 %v3440_v26  ;;  %v3529_v25 = vld [vmem:[#allocation2 + $0x44c] ss:$16 sps:$4 sm:$0xff]   ;;  %v3524_v26 = vld [vmem:[#allocation2 + $0x460] ss:$16 sps:$4 sm:$0xff]  }
  0x9f   :  { %1528 = vmatprep.subr.bf16.mxu1 %v3443_v27  ;;  %v3527_v27 = vld [vmem:[#allocation2 + $0x448] ss:$16 sps:$4 sm:$0xff]  }
  0xa1   :  { %1367 = vmatpush1.bf16.msra.mxu0 %v3438_v28  ;;  %v3532_v28 = vld [vmem:[#allocation2 + $0x484] ss:$16 sps:$4 sm:$0xff]  }
  0xa2   :  { %1529 = vmatpush1.bf16.msra.mxu1 %v3441_v29  ;;  %1368 = vmatprep.subr.bf16.mxu0 %v3446_v30  ;;  %v3535_v29 = vld [vmem:[#allocation2 + $0x46c] ss:$16 sps:$4 sm:$0xff]   ;;  %v3530_v30 = vld [vmem:[#allocation2 + $0x480] ss:$16 sps:$4 sm:$0xff]  }
  0xa3   :  { %1530 = vmatprep.subr.bf16.mxu1 %v3449_v31  ;;  %v3533_v31 = vld [vmem:[#allocation2 + $0x468] ss:$16 sps:$4 sm:$0xff]  }
  0xa5   :  { %1369 = vmatpush1.bf16.msra.mxu0 %v3444_v33  ;;  %v3541_v33 = vld [vmem:[#allocation2 + $0x48c] ss:$16 sps:$4 sm:$0xff]  }
  0xa6   :  { %1531 = vmatpush1.bf16.msra.mxu1 %v3447_v34  ;;  %1370 = vmatprep.subr.bf16.mxu0 %v3452_v36  ;;  %v3536_v34 = vld [vmem:[#allocation2 + $0x4a0] ss:$16 sps:$4 sm:$0xff]   ;;  %v3544_v36 = vld [vmem:[#allocation2 + $0x4c4] ss:$16 sps:$4 sm:$0xff]  }
  0xa7   :  { %1532 = vmatprep.subr.bf16.mxu1 %v3455_v37  ;;  %v3547_v37 = vld [vmem:[#allocation2 + $0x4ac] ss:$16 sps:$4 sm:$0xff]  }
  0xa9   :  { %1371 = vmatpush1.bf16.msra.mxu0 %v3450_v38  ;;  %v3542_v38 = vld [vmem:[#allocation2 + $0x4c0] ss:$16 sps:$4 sm:$0xff]  }
  0xaa   :  { %1533 = vmatpush1.bf16.msra.mxu1 %v3453_v39  ;;  %1372 = vmatprep.subr.bf16.mxu0 %v3458_v40  ;;  %v3545_v39 = vld [vmem:[#allocation2 + $0x4a8] ss:$16 sps:$4 sm:$0xff]   ;;  %v3550_v40 = vld [vmem:[#allocation2 + $0x4e4] ss:$16 sps:$4 sm:$0xff]  }
  0xab   :  { %1534 = vmatprep.subr.bf16.mxu1 %v3461_v41  ;;  %v3553_v41 = vld [vmem:[#allocation2 + $0x4cc] ss:$16 sps:$4 sm:$0xff]  }
  0xad   :  { %1373 = vmatpush1.bf16.msra.mxu0 %v3456_v42  ;;  %v3548_v42 = vld [vmem:[#allocation2 + $0x4e0] ss:$16 sps:$4 sm:$0xff]  }
  0xae   :  { %1535 = vmatpush1.bf16.msra.mxu1 %v3459_v43  ;;  %1374 = vmatprep.subr.bf16.mxu0 %v3464_v44  ;;  %v3551_v43 = vld [vmem:[#allocation2 + $0x4c8] ss:$16 sps:$4 sm:$0xff]   ;;  %v3556_v44 = vld [vmem:[#allocation2 + $0x504] ss:$16 sps:$4 sm:$0xff]  }
  0xaf   :  { %1536 = vmatprep.subr.bf16.mxu1 %v3467_v45  ;;  %v3559_v45 = vld [vmem:[#allocation2 + $0x4ec] ss:$16 sps:$4 sm:$0xff]  }
  0xb1   :  { %1375 = vmatpush1.bf16.msra.mxu0 %v3462_v46  ;;  %v3554_v46 = vld [vmem:[#allocation2 + $0x500] ss:$16 sps:$4 sm:$0xff]  }
  0xb2   :  { %1537 = vmatpush1.bf16.msra.mxu1 %v3465_v47  ;;  %1376 = vmatprep.subr.bf16.mxu0 %v3470_v48  ;;  %v3557_v47 = vld [vmem:[#allocation2 + $0x4e8] ss:$16 sps:$4 sm:$0xff]   ;;  %v3562_v48 = vld [vmem:[#allocation2 + $0x524] ss:$16 sps:$4 sm:$0xff]  }
  0xb3   :  { %1538 = vmatprep.subr.bf16.mxu1 %v3473_v49  ;;  %v3565_v49 = vld [vmem:[#allocation2 + $0x50c] ss:$16 sps:$4 sm:$0xff]  }
  0xb5   :  { %1377 = vmatpush1.bf16.msra.mxu0 %v3468_v50  ;;  %v3560_v50 = vld [vmem:[#allocation2 + $0x520] ss:$16 sps:$4 sm:$0xff]  }
  0xb6   :  { %1539 = vmatpush1.bf16.msra.mxu1 %v3471_v51  ;;  %1378 = vmatprep.subr.bf16.mxu0 %v3476_v52  ;;  %v3563_v51 = vld [vmem:[#allocation2 + $0x508] ss:$16 sps:$4 sm:$0xff]   ;;  %v3568_v52 = vld [vmem:[#allocation2 + $0x544] ss:$16 sps:$4 sm:$0xff]  }
  0xb7   :  { %1540 = vmatprep.subr.bf16.mxu1 %v3479_v53  ;;  %v3571_v53 = vld [vmem:[#allocation2 + $0x52c] ss:$16 sps:$4 sm:$0xff]  }
  0xb9   :  { %1379 = vmatpush1.bf16.msra.mxu0 %v3474_v54  ;;  %v3566_v54 = vld [vmem:[#allocation2 + $0x540] ss:$16 sps:$4 sm:$0xff]  }
  0xba   :  { %1541 = vmatpush1.bf16.msra.mxu1 %v3477_v55  ;;  %1380 = vmatprep.subr.bf16.mxu0 %v3482_v56  ;;  %v3569_v55 = vld [vmem:[#allocation2 + $0x528] ss:$16 sps:$4 sm:$0xff]   ;;  %v3574_v56 = vld [vmem:[#allocation2 + $0x564] ss:$16 sps:$4 sm:$0xff]  }
  0xbb   :  { %1542 = vmatprep.subr.bf16.mxu1 %v3485_v57  ;;  %v3577_v57 = vld [vmem:[#allocation2 + $0x54c] ss:$16 sps:$4 sm:$0xff]  }
  0xbd   :  { %1381 = vmatpush1.bf16.msra.mxu0 %v3480_v58  ;;  %v3572_v58 = vld [vmem:[#allocation2 + $0x560] ss:$16 sps:$4 sm:$0xff]  }
  0xbe   :  { %1543 = vmatpush1.bf16.msra.mxu1 %v3483_v59  ;;  %1382 = vmatprep.subr.bf16.mxu0 %v3488_v60  ;;  %v3575_v59 = vld [vmem:[#allocation2 + $0x548] ss:$16 sps:$4 sm:$0xff]   ;;  %v3580_v60 = vld [vmem:[#allocation2 + $0x584] ss:$16 sps:$4 sm:$0xff]  }
  0xbf   :  { %1544 = vmatprep.subr.bf16.mxu1 %v3491_v61  ;;  %v3583_v61 = vld [vmem:[#allocation2 + $0x56c] ss:$16 sps:$4 sm:$0xff]  }
  0xc1   :  { %1383 = vmatpush1.bf16.msra.mxu0 %v3486_v62  ;;  %v3578_v62 = vld [vmem:[#allocation2 + $0x580] ss:$16 sps:$4 sm:$0xff]  }
  0xc2   :  { %1545 = vmatpush1.bf16.msra.mxu1 %v3489_v63  ;;  %1384 = vmatprep.subr.bf16.mxu0 %v3494_v1  ;;  %v3581_v63 = vld [vmem:[#allocation2 + $0x568] ss:$16 sps:$4 sm:$0xff]   ;;  %v3586_v1 = vld [vmem:[#allocation2 + $0x5a4] ss:$16 sps:$4 sm:$0xff]  }
  0xc3   :  { %1546 = vmatprep.subr.bf16.mxu1 %v3497_v2  ;;  %v3589_v2 = vld [vmem:[#allocation2 + $0x58c] ss:$16 sps:$4 sm:$0xff]  }
  0xc5   :  { %1385 = vmatpush1.bf16.msra.mxu0 %v3492_v3  ;;  %v3584_v3 = vld [vmem:[#allocation2 + $0x5a0] ss:$16 sps:$4 sm:$0xff]  }
  0xc6   :  { %1547 = vmatpush1.bf16.msra.mxu1 %v3495_v4  ;;  %1386 = vmatprep.subr.bf16.mxu0 %v3500_v5  ;;  %v3587_v4 = vld [vmem:[#allocation2 + $0x588] ss:$16 sps:$4 sm:$0xff]   ;;  %v3592_v5 = vld [vmem:[#allocation2 + $0x5c4] ss:$16 sps:$4 sm:$0xff]  }
  0xc7   :  { %1548 = vmatprep.subr.bf16.mxu1 %v3503_v6  ;;  %v3595_v6 = vld [vmem:[#allocation2 + $0x5ac] ss:$16 sps:$4 sm:$0xff]  }
  0xc9   :  { %1387 = vmatpush1.bf16.msra.mxu0 %v3498_v7  ;;  %v3590_v7 = vld [vmem:[#allocation2 + $0x5c0] ss:$16 sps:$4 sm:$0xff]  }
  0xca   :  { %1549 = vmatpush1.bf16.msra.mxu1 %v3501_v8  ;;  %1397 = vmatprep.subr.bf16.mxu0 %v3508_v9  ;;  %v3593_v8 = vld [vmem:[#allocation2 + $0x5a8] ss:$16 sps:$4 sm:$0xff]   ;;  %v3598_v9 = vld [vmem:[#allocation2 + $0x5e4] ss:$16 sps:$4 sm:$0xff]  }
  0xcb   :  { %1550 = vmatprep.subr.bf16.mxu1 %v3511_v10  ;;  %v3601_v10 = vld [vmem:[#allocation2 + $0x5cc] ss:$16 sps:$4 sm:$0xff]  }
  0xcc   :  { %1389 = vmatmul.mubr.bf16.vlgmr.msra.gmra.mrb[0].mxu0 %v2890_v11 }
  0xcd   :  { %1398 = vmatpush1.bf16.msra.mxu0 %v3506_v12  ;;  %1429 = vmatprep.mubr.bf16.mxu0 %v2893_v19  ;;  %v3599_v12 = vld [vmem:[#allocation2 + $0x5c8] ss:$16 sps:$4 sm:$0xff]  }
  0xce   :  { %1551 = vmatpush1.bf16.msra.mxu1 %v3509_v13  ;;  %1399 = vmatprep.subr.bf16.mxu0 %v3514_v14  ;;  %v3606_v13 = vld [vmem:[#allocation2 + $0x5ec] ss:$16 sps:$4 sm:$0xff]   ;;  %v2892_v14 = vcombine.low %v4054_v16, %v4054_v16 }
  0xcf   :  { %1561 = vmatprep.subr.bf16.mxu1 %v3517_v15  ;;  %v3604_v15 = vld [vmem:[#allocation2 + $0x5e8] ss:$16 sps:$4 sm:$0xff]  }
  0xd1   :  { %1553 = vmatmul.mubr.bf16.vlgmr.msra.gmra.mrb[4].mxu1 %v2890_v11  ;;  %1400 = vmatpush1.bf16.msra.mxu0 %v3512_v17  ;;  %v3596_v11 = vld [vmem:[#allocation2 + $0x5e0] ss:$16 sps:$4 sm:$0xff]   ;;  %v3609_v17 = vld [vmem:[#allocation2 + $0x60c] ss:$16 sps:$4 sm:$0xff]  }
  0xd2   :  { %1562 = vmatpush1.bf16.msra.mxu1 %v3515_v18  ;;  %1401 = vmatprep.subr.bf16.mxu0 %v3520_v20  ;;  %v3607_v18 = vld [vmem:[#allocation2 + $0x608] ss:$16 sps:$4 sm:$0xff]  }
  0xd3   :  { %1563 = vmatprep.subr.bf16.mxu1 %v3523_v21  ;;  %1593 = vmatprep.mubr.bf16.mxu1 %v2893_v19  ;;  %v3758_v19 = vld [vmem:[%s4399_s0 + $0x18] ss:$0 sps:$4 sm:$0xff]  }
  0xd5   :  { %1402 = vmatpush1.bf16.msra.mxu0 %v3518_v22 }
  0xd6   :  { %1564 = vmatpush1.bf16.msra.mxu1 %v3521_v23  ;;  %1403 = vmatprep.subr.bf16.mxu0 %v3526_v24  ;;  %v3612_v23 = vld [vmem:[%s4403_s4 + $0x4] ss:$8 sps:$4 sm:$0xff]   ;;  %v3615_v24 = vld [vmem:[%s4403_s4 + $0x14] ss:$8 sps:$4 sm:$0xff]  }
  0xd7   :  { %1565 = vmatprep.subr.bf16.mxu1 %v3529_v25  ;;  %v3613_v25 = vld [vmem:[%s4403_s4 + $0x10] ss:$8 sps:$4 sm:$0xff]  }
  0xd9   :  { %1404 = vmatpush1.bf16.msra.mxu0 %v3524_v26  ;;  %v3618_v26 = vld [vmem:[%s4403_s4 + $0x24] ss:$8 sps:$4 sm:$0xff]  }
  0xda   :  { %1566 = vmatpush1.bf16.msra.mxu1 %v3527_v27  ;;  %1405 = vmatprep.subr.bf16.mxu0 %v3532_v28  ;;  %v3616_v27 = vld [vmem:[%s4403_s4 + $0x20] ss:$8 sps:$4 sm:$0xff]   ;;  %v3621_v28 = vld [vmem:[%s4403_s4 + $0x34] ss:$8 sps:$4 sm:$0xff]  }
  0xdb   :  { %1567 = vmatprep.subr.bf16.mxu1 %v3535_v29  ;;  %v3619_v29 = vld [vmem:[%s4403_s4 + $0x30] ss:$8 sps:$4 sm:$0xff]  }
  0xdd   :  { %1406 = vmatpush1.bf16.msra.mxu0 %v3530_v30  ;;  %v3624_v30 = vld [vmem:[%s4403_s4 + $0x44] ss:$8 sps:$4 sm:$0xff]  }
  0xde   :  { %1568 = vmatpush1.bf16.msra.mxu1 %v3533_v31  ;;  %1407 = vmatprep.subr.bf16.mxu0 %v3538_v32  ;;  %v3622_v31 = vld [vmem:[%s4403_s4 + $0x40] ss:$8 sps:$4 sm:$0xff]   ;;  %v3627_v32 = vld [vmem:[%s4403_s4 + $0x54] ss:$8 sps:$4 sm:$0xff]  }
  0xdf   :  { %1569 = vmatprep.subr.bf16.mxu1 %v3541_v33  ;;  %v3625_v33 = vld [vmem:[%s4403_s4 + $0x50] ss:$8 sps:$4 sm:$0xff]  }
  0xe1   :  { %1408 = vmatpush1.bf16.msra.mxu0 %v3536_v34  ;;  %v3630_v34 = vld [vmem:[%s4403_s4 + $0x64] ss:$8 sps:$4 sm:$0xff]  }
  0xe2   :  { %1570 = vmatpush1.bf16.msra.mxu1 %v3539_v35  ;;  %1409 = vmatprep.subr.bf16.mxu0 %v3544_v36  ;;  %v3628_v35 = vld [vmem:[%s4403_s4 + $0x60] ss:$8 sps:$4 sm:$0xff]   ;;  %v3633_v36 = vld [vmem:[%s4403_s4 + $0x74] ss:$8 sps:$4 sm:$0xff]  }
  0xe3   :  { %1571 = vmatprep.subr.bf16.mxu1 %v3547_v37  ;;  %v3631_v37 = vld [vmem:[%s4403_s4 + $0x70] ss:$8 sps:$4 sm:$0xff]  }
  0xe5   :  { %1410 = vmatpush1.bf16.msra.mxu0 %v3542_v38  ;;  %v3636_v38 = vld [vmem:[%s4403_s4 + $0x84] ss:$8 sps:$4 sm:$0xff]  }
  0xe6   :  { %1572 = vmatpush1.bf16.msra.mxu1 %v3545_v39  ;;  %1411 = vmatprep.subr.bf16.mxu0 %v3550_v40  ;;  %v3634_v39 = vld [vmem:[%s4403_s4 + $0x80] ss:$8 sps:$4 sm:$0xff]   ;;  %v3639_v40 = vld [vmem:[%s4403_s4 + $0x94] ss:$8 sps:$4 sm:$0xff]  }
  0xe7   :  { %1573 = vmatprep.subr.bf16.mxu1 %v3553_v41  ;;  %v3637_v41 = vld [vmem:[%s4403_s4 + $0x90] ss:$8 sps:$4 sm:$0xff]  }
  0xe9   :  { %1412 = vmatpush1.bf16.msra.mxu0 %v3548_v42  ;;  %v3642_v42 = vld [vmem:[%s4403_s4 + $0xa4] ss:$8 sps:$4 sm:$0xff]  }
  0xea   :  { %1574 = vmatpush1.bf16.msra.mxu1 %v3551_v43  ;;  %1413 = vmatprep.subr.bf16.mxu0 %v3556_v44  ;;  %v3640_v43 = vld [vmem:[%s4403_s4 + $0xa0] ss:$8 sps:$4 sm:$0xff]   ;;  %v3645_v44 = vld [vmem:[%s4403_s4 + $0xb4] ss:$8 sps:$4 sm:$0xff]  }
  0xeb   :  { %1575 = vmatprep.subr.bf16.mxu1 %v3559_v45  ;;  %v3643_v45 = vld [vmem:[%s4403_s4 + $0xb0] ss:$8 sps:$4 sm:$0xff]  }
  0xed   :  { %1414 = vmatpush1.bf16.msra.mxu0 %v3554_v46  ;;  %v3648_v46 = vld [vmem:[%s4403_s4 + $0xc4] ss:$8 sps:$4 sm:$0xff]  }
  0xee   :  { %1576 = vmatpush1.bf16.msra.mxu1 %v3557_v47  ;;  %1415 = vmatprep.subr.bf16.mxu0 %v3562_v48  ;;  %v3646_v47 = vld [vmem:[%s4403_s4 + $0xc0] ss:$8 sps:$4 sm:$0xff]   ;;  %v3651_v48 = vld [vmem:[%s4403_s4 + $0xd4] ss:$8 sps:$4 sm:$0xff]  }
  0xef   :  { %1577 = vmatprep.subr.bf16.mxu1 %v3565_v49  ;;  %v3649_v49 = vld [vmem:[%s4403_s4 + $0xd0] ss:$8 sps:$4 sm:$0xff]  }
  0xf1   :  { %1416 = vmatpush1.bf16.msra.mxu0 %v3560_v50  ;;  %v3654_v50 = vld [vmem:[%s4403_s4 + $0xe4] ss:$8 sps:$4 sm:$0xff]  }
  0xf2   :  { %1578 = vmatpush1.bf16.msra.mxu1 %v3563_v51  ;;  %1417 = vmatprep.subr.bf16.mxu0 %v3568_v52  ;;  %v3652_v51 = vld [vmem:[%s4403_s4 + $0xe0] ss:$8 sps:$4 sm:$0xff]   ;;  %v3657_v52 = vld [vmem:[%s4403_s4 + $0xf4] ss:$8 sps:$4 sm:$0xff]  }
  0xf3   :  { %1579 = vmatprep.subr.bf16.mxu1 %v3571_v53  ;;  %v3655_v53 = vld [vmem:[%s4403_s4 + $0xf0] ss:$8 sps:$4 sm:$0xff]  }
  0xf5   :  { %1418 = vmatpush1.bf16.msra.mxu0 %v3566_v54  ;;  %v3660_v54 = vld [vmem:[%s4403_s4 + $0x104] ss:$8 sps:$4 sm:$0xff]  }
  0xf6   :  { %1580 = vmatpush1.bf16.msra.mxu1 %v3569_v55  ;;  %1419 = vmatprep.subr.bf16.mxu0 %v3574_v56 }
  0xf7   :  { %1581 = vmatprep.subr.bf16.mxu1 %v3577_v57 }
  0xf9   :  { %1420 = vmatpush1.bf16.msra.mxu0 %v3572_v58 }
  0xfa   :  { %1582 = vmatpush1.bf16.msra.mxu1 %v3575_v59  ;;  %1421 = vmatprep.subr.bf16.mxu0 %v3580_v60 }
  0xfb   :  { %1583 = vmatprep.subr.bf16.mxu1 %v3583_v61 }
  0xfd   :  { %1422 = vmatpush1.bf16.msra.mxu0 %v3578_v62 }
  0xfe   :  { %1584 = vmatpush1.bf16.msra.mxu1 %v3581_v63  ;;  %1423 = vmatprep.subr.bf16.mxu0 %v3586_v1 }
  0xff   :  { %1585 = vmatprep.subr.bf16.mxu1 %v3589_v2 }
 0x101   :  { %1424 = vmatpush1.bf16.msra.mxu0 %v3584_v3 }
 0x102   :  { %1586 = vmatpush1.bf16.msra.mxu1 %v3587_v4  ;;  %1425 = vmatprep.subr.bf16.mxu0 %v3592_v5 }
 0x103   :  { %1587 = vmatprep.subr.bf16.mxu1 %v3595_v6 }
 0x105   :  { %1426 = vmatpush1.bf16.msra.mxu0 %v3590_v7 }
 0x106   :  { %1588 = vmatpush1.bf16.msra.mxu1 %v3593_v8  ;;  %1427 = vmatprep.subr.bf16.mxu0 %v3598_v9 }
 0x107   :  { %1589 = vmatprep.subr.bf16.mxu1 %v3601_v10 }
 0x109   :  { %1428 = vmatpush1.bf16.msra.mxu0 %v3596_v11 }
 0x10a   :  { %1590 = vmatpush1.bf16.msra.mxu1 %v3599_v12  ;;  %2218 = vmatprep.subr.bf16.mxu0 %v3612_v23 }
 0x10b   :  { %1591 = vmatprep.subr.bf16.mxu1 %v3606_v13 }
 0x10c   :  { %1430 = vmatmul.mubr.bf16.vlgmr.msra.gmra.mrb[0].mxu0 %v2892_v14 }
 0x10e   :  { %1592 = vmatpush1.bf16.msra.mxu1 %v3604_v15 }
 0x10f   :  { %1602 = vmatprep.subr.bf16.mxu1 %v3609_v17 }
 0x111   :  { %1594 = vmatmul.mubr.bf16.vlgmr.msra.gmra.mrb[4].mxu1 %v2892_v14 }
 0x112   :  { %1603 = vmatpush1.bf16.msra.mxu1 %v3607_v18  ;;  %1634 = vmatprep.mubr.bf16.mxu1 %v3885_v0  ;;  %v3610_v0 = vld [vmem:[%s4403_s4] ss:$8 sps:$4 sm:$0xff]  }
 0x113   :  { %2219 = vmatpush1.bf16.msra.mxu0 %v3610_v0  ;;  %v1723_v0 = vlaneseq }
 0x114   :  { %2220 = vmatprep.subr.bf16.mxu0 %v3615_v24 }
 0x117   :  { %2221 = vmatpush1.bf16.msra.mxu0 %v3613_v25 }
 0x118   :  { %2222 = vmatprep.subr.bf16.mxu0 %v3618_v26 }
 0x11b   :  { %2223 = vmatpush1.bf16.msra.mxu0 %v3616_v27 }
 0x11c   :  { %2224 = vmatprep.subr.bf16.mxu0 %v3621_v28 }
 0x11d   :  { %3092 = vmatmul.mubr.msk.bf16.vlgmr.msra.gmra.mrb[4].mxu1 %vm1311_vm0, %v3758_v19 }
 0x11f   :  { %2225 = vmatpush1.bf16.msra.mxu0 %v3619_v29 }
 0x120   :  { %2226 = vmatprep.subr.bf16.mxu0 %v3624_v30 }
 0x123   :  { %2227 = vmatpush1.bf16.msra.mxu0 %v3622_v31 }
 0x124   :  { %v4065_v16 = vpop.f32.mrb[0].mxu1  ;;  %2228 = vmatprep.subr.bf16.mxu0 %v3627_v32 }
 0x125   :  { %v4067_v20 = vpop.f32.mrb[1].mxu1 }
 0x126   :  { %v1476_v21 = vpop.f32.mrb[2].mxu1 }
 0x127   :  { %v1477_v22 = vpop.f32.mrb[3].mxu1  ;;  %2229 = vmatpush1.bf16.msra.mxu0 %v3625_v33 }
 0x128   :  { %2230 = vmatprep.subr.bf16.mxu0 %v3630_v34 }
 0x12b   :  { %2231 = vmatpush1.bf16.msra.mxu0 %v3628_v35 }
 0x12c   :  { %2232 = vmatprep.subr.bf16.mxu0 %v3633_v36 }
 0x12f   :  { %2233 = vmatpush1.bf16.msra.mxu0 %v3631_v37 }
 0x130   :  { %2234 = vmatprep.subr.bf16.mxu0 %v3636_v38 }
 0x133   :  { %2235 = vmatpush1.bf16.msra.mxu0 %v3634_v39 }
 0x134   :  { %2236 = vmatprep.subr.bf16.mxu0 %v3639_v40 }
 0x137   :  { %2237 = vmatpush1.bf16.msra.mxu0 %v3637_v41 }
 0x138   :  { %2238 = vmatprep.subr.bf16.mxu0 %v3642_v42 }
 0x13b   :  { %2239 = vmatpush1.bf16.msra.mxu0 %v3640_v43 }
 0x13c   :  { %2240 = vmatprep.subr.bf16.mxu0 %v3645_v44 }
 0x13f   :  { %2241 = vmatpush1.bf16.msra.mxu0 %v3643_v45 }
 0x140   :  { %2242 = vmatprep.subr.bf16.mxu0 %v3648_v46 }
 0x143   :  { %2243 = vmatpush1.bf16.msra.mxu0 %v3646_v47  ;;  %v4202_v47 = vshrl.u32 %v1723_v0, 7 }
 0x144   :  { %2244 = vmatprep.subr.bf16.mxu0 %v3651_v48 }
 0x147   :  { %2245 = vmatpush1.bf16.msra.mxu0 %v3649_v49 }
 0x148   :  { %2246 = vmatprep.subr.bf16.mxu0 %v3654_v50 }
 0x14b   :  { %2247 = vmatpush1.bf16.msra.mxu0 %v3652_v51 }
 0x14c   :  { %2248 = vmatprep.subr.bf16.mxu0 %v3657_v52 }
 0x14f   :  { %2249 = vmatpush1.bf16.msra.mxu0 %v3655_v53 }
 0x150   :  { %2259 = vmatprep.subr.bf16.mxu0 %v3660_v54 }
 0x1df   :  { %v1431_v55 = vpop.f32.mrb[0].mxu0 }
 0x1e0   :  { %v4169_v56 = vadd.f32 %v4065_v16, %v1431_v55  ;;  %v1433_v57 = vpop.f32.mrb[1].mxu0 }
 0x1e1   :  { %v4172_v58 = vadd.f32 %v4067_v20, %v1433_v57  ;;  %v1435_v59 = vpop.f32.mrb[2].mxu0 }
 0x1e2   :  { %v1645_v60 = vrot.slane %v4169_v56, 4  ;;  %v1674_v61 = vmul.f32 %v4169_v56, %v4169_v56  ;;  %v1436_v62 = vpop.f32.mrb[3].mxu0  ;;  %v4205_v59 = vsub.s32 0, %v4202_v47 }
 0x1e3   :  { %v1651_v63 = vrot.slane %v4172_v58, 4  ;;  %v1675_v1 = vmul.f32 %v4172_v58, %v4172_v58  ;;  %v1643_v62 = vld [vmem:[%s4401_s2] sm:$0xf] }
 0x1e4   :  { %v1646_v2 = vadd.f32 %v4169_v56, %v1645_v60  ;;  %v1678_v3 = vrot.slane %v1674_v61, 4 }
 0x1e5   :  { %v1652_v4 = vadd.f32 %v4172_v58, %v1651_v63  ;;  %v1684_v5 = vrot.slane %v1675_v1, 4 }
 0x1e6   :  { %v1647_v6 = vrot.slane %v1646_v2, 2  ;;  %v1679_v7 = vadd.f32 %v1678_v3, %v1674_v61 }
 0x1e7   :  { %v1653_v8 = vrot.slane %v1652_v4, 2  ;;  %v1685_v9 = vadd.f32 %v1684_v5, %v1675_v1 }
 0x1e8   :  { %v1648_v10 = vadd.f32 %v1647_v6, %v1646_v2  ;;  %v1680_v11 = vrot.slane %v1679_v7, 2  ;;  %v4211_v2 = vsub.s32 1, %v4202_v47 }
 0x1e9   :  { %v1654_v12 = vadd.f32 %v1653_v8, %v1652_v4  ;;  %v1686_v13 = vrot.slane %v1685_v9, 2 }
 0x1ea   :  { %v1649_v14 = vrot.slane %v1648_v10, 1  ;;  %v1681_v15 = vadd.f32 %v1680_v11, %v1679_v7  ;;  %v1726_v7 = vrot.slane %v1643_v62, %v4205_v59 }
 0x1eb   :  { %v1655_v17 = vrot.slane %v1654_v12, 1  ;;  %v1687_v18 = vadd.f32 %v1686_v13, %v1685_v9 }
 0x1ec   :  { %v1650_v19 = vadd.f32 %v1649_v14, %v1648_v10  ;;  %v1682_v16 = vrot.slane %v1681_v15, 1 }
 0x1ed   :  { %v1656_v20 = vadd.f32 %v1655_v17, %v1654_v12  ;;  %v1688_v21 = vrot.slane %v1687_v18, 1  ;;  %v1730_v12 = vrot.slane %v1643_v62, %v4211_v2 }
 0x1ee   :  { %v4182_v22 = vmul.f32 0.125, %v1650_v19  ;;  %v1683_v23 = vadd.f32 %v1682_v16, %v1681_v15 }
 0x1ef   :  { %v4184_v24 = vmul.f32 0.125, %v1656_v20  ;;  %v1689_v25 = vadd.f32 %v1688_v21, %v1687_v18 }
 0x1f0   :  { %v4186_v26 = vpop.f32.mrb[4].mxu1  ;;  %v1702_v27 = vmul.f32 0.125, %v1683_v23  ;;  %v1706_v28 = vmul.f32 %v4182_v22, %v4182_v22 }
 0x1f1   :  { %v1657_v29 = vrot.slane %v4186_v26, 4  ;;  %v1676_v30 = vmul.f32 %v4186_v26, %v4186_v26  ;;  %v4193_v31 = vpop.f32.mrb[5].mxu1  ;;  %v1703_v32 = vmul.f32 0.125, %v1689_v25  ;;  %v1707_v33 = vmul.f32 %v4184_v24, %v4184_v24 }
 0x1f2   :  { %v1663_v34 = vrot.slane %v4193_v31, 4  ;;  %v1677_v35 = vmul.f32 %v4193_v31, %v4193_v31  ;;  %v1640_v36 = vpop.f32.mrb[6].mxu1  ;;  %v1710_v37 = vsub.f32 %v1702_v27, %v1706_v28  ;;  %v1733_v28 = vsub.s32 2, %v4202_v47 }
 0x1f3   :  { %v1658_v38 = vadd.f32 %v1657_v29, %v4186_v26  ;;  %v1690_v39 = vrot.slane %v1676_v30, 4  ;;  %v1641_v40 = vpop.f32.mrb[7].mxu1  ;;  %v1711_v41 = vsub.f32 %v1703_v32, %v1707_v33  ;;  %v1737_v29 = vsub.s32 3, %v4202_v47 }
 0x1f4   :  { %v1664_v42 = vadd.f32 %v1663_v34, %v4193_v31  ;;  %v1696_v43 = vrot.slane %v1677_v35, 4  ;;  %v1714_v44 = vadd.f32 1e-05, %v1710_v37  ;;  %v1734_v33 = vrot.slane %v1643_v62, %v1733_v28 }
 0x1f5   :  { %v1659_v45 = vrot.slane %v1658_v38, 2  ;;  %v1691_v46 = vadd.f32 %v1690_v39, %v1676_v30  ;;  %v1715_v48 = vadd.f32 1e-05, %v1711_v41  ;;  %v3886_v30 = vmov 1966171168  }
 0x1f6   :  { %v1665_v49 = vrot.slane %v1664_v42, 2  ;;  %v1697_v50 = vadd.f32 %v1696_v43, %v1677_v35  ;;  %3738 = vrsqrt.f32 %v1714_v44  ;;  %v1758_v32 = vunpack.c.l.s4 %v3886_v30  ;;  %v3693_v30 = vld [vmem:[%s4403_s4 + $0x1b4] ss:$8 sps:$4 sm:$0xff]  }
 0x1f7   :  { %v1660_v51 = vadd.f32 %v1659_v45, %v1658_v38  ;;  %v1692_v52 = vrot.slane %v1691_v46, 2  ;;  %3740 = vrsqrt.f32 %v1715_v48  ;;  %v1738_v34 = vrot.slane %v1643_v62, %v1737_v29 }
 0x1f8   :  { %v1666_v53 = vadd.f32 %v1665_v49, %v1664_v42  ;;  %v1698_v54 = vrot.slane %v1697_v50, 2  ;;  %v1759_v36 = vunpack.c.0.s8 %v1758_v32  ;;  %v3691_v32 = vld [vmem:[%s4403_s4 + $0x1b0] ss:$8 sps:$4 sm:$0xff]  }
 0x1f9   :  { %v1661_v55 = vrot.slane %v1660_v51, 1  ;;  %v1693_v57 = vadd.f32 %v1692_v52, %v1691_v46 }
 0x1fa   :  { %v1667_v60 = vrot.slane %v1666_v53, 1  ;;  %v1699_v61 = vadd.f32 %v1698_v54, %v1697_v50  ;;  %v1644_v50 = vld [vmem:[%s4402_s3] sm:$0xf] }
 0x1fb   :  { %v1662_v63 = vadd.f32 %v1661_v55, %v1660_v51  ;;  %v1694_v1 = vrot.slane %v1693_v57, 1 }
 0x1fc   :  { %v1668_v3 = vadd.f32 %v1667_v60, %v1666_v53  ;;  %v1700_v4 = vrot.slane %v1699_v61, 1 }
 0x1fd   :  { %v1672_v5 = vmul.f32 0.125, %v1662_v63  ;;  %v1695_v6 = vadd.f32 %v1694_v1, %v1693_v57 }
 0x1fe   :  { %v1673_v8 = vmul.f32 0.125, %v1668_v3  ;;  %v1701_v9 = vadd.f32 %v1700_v4, %v1699_v61 }
 0x1ff   :  { %v1704_v10 = vmul.f32 0.125, %v1695_v6  ;;  %v1708_v11 = vmul.f32 %v1672_v5, %v1672_v5 }
 0x200   :  { %v1705_v13 = vmul.f32 0.125, %v1701_v9  ;;  %v1709_v14 = vmul.f32 %v1673_v8, %v1673_v8  ;;  %v3739_v15 = vpop.eup %3738  ;;  %v3661_v9 = vld [vmem:[%s4403_s4 + $0x110] ss:$8 sps:$4 sm:$0xff]  }
 0x201   :  { %v1712_v17 = vsub.f32 %v1704_v10, %v1708_v11  ;;  %v3741_v18 = vpop.eup %3740  ;;  %v1743_v19 = vmul.f32 %v3739_v15, %v1726_v7  ;;  %v3666_v10 = vld [vmem:[%s4403_s4 + $0x124] ss:$8 sps:$4 sm:$0xff]   ;;  %v3664_v11 = vld [vmem:[%s4403_s4 + $0x120] ss:$8 sps:$4 sm:$0xff]  }
 0x202   :  { %v1713_v16 = vsub.f32 %v1705_v13, %v1709_v14  ;;  %v1744_v21 = vmul.f32 %v3741_v18, %v1730_v12  ;;  %v3669_v12 = vld [vmem:[%s4403_s4 + $0x134] ss:$8 sps:$4 sm:$0xff]   ;;  %v3667_v13 = vld [vmem:[%s4403_s4 + $0x130] ss:$8 sps:$4 sm:$0xff]   ;;  %v3672_v14 = vld [vmem:[%s4403_s4 + $0x144] ss:$8 sps:$4 sm:$0xff]  }
 0x203   :  { %v1716_v20 = vadd.f32 1e-05, %v1712_v17  ;;  %v1747_v23 = vmul.f32 %v1743_v19, %v4182_v22  ;;  %v1784_v48 = vrot.slane %v1743_v19, %v4205_v59  ;;  %v3670_v15 = vld [vmem:[%s4403_s4 + $0x140] ss:$8 sps:$4 sm:$0xff]   ;;  %v3675_v17 = vld [vmem:[%s4403_s4 + $0x154] ss:$8 sps:$4 sm:$0xff]  }
 0x204   :  { %v1717_v0 = vadd.f32 1e-05, %v1713_v16  ;;  %v1748_v25 = vmul.f32 %v1744_v21, %v4184_v24  ;;  %v4221_v24 = vsub.s32 %v1759_v36, %v4202_v47  ;;  %v1788_v51 = vrot.slane %v1744_v21, %v4205_v59  ;;  %v3673_v18 = vld [vmem:[%s4403_s4 + $0x150] ss:$8 sps:$4 sm:$0xff]   ;;  %v3678_v19 = vld [vmem:[%s4403_s4 + $0x164] ss:$8 sps:$4 sm:$0xff]  }
 0x205   :  { %3742 = vrsqrt.f32 %v1716_v20  ;;  %v3676_v16 = vld [vmem:[%s4403_s4 + $0x160] ss:$8 sps:$4 sm:$0xff]   ;;  %v3681_v20 = vld [vmem:[%s4403_s4 + $0x174] ss:$8 sps:$4 sm:$0xff]   ;;  %v3679_v21 = vld [vmem:[%s4403_s4 + $0x170] ss:$8 sps:$4 sm:$0xff]  }
 0x206   :  { %3744 = vrsqrt.f32 %v1717_v0  ;;  %v1755_v27 = vcombine.low %v1747_v23, %v1748_v25  ;;  %v1798_v54 = vmul.f32 %v4172_v58, %v1788_v51  ;;  %v3684_v23 = vld [vmem:[%s4403_s4 + $0x184] ss:$8 sps:$4 sm:$0xff]   ;;  %v3682_v0 = vld [vmem:[%s4403_s4 + $0x180] ss:$8 sps:$4 sm:$0xff]   ;;  %v3687_v25 = vld [vmem:[%s4403_s4 + $0x194] ss:$8 sps:$4 sm:$0xff]  }
 0x207   :  { %v3697_v36 = vld [vmem:[%s4403_s4 + $0x1d0] ss:$8 sps:$4 sm:$0xff]   ;;  %v3714_v51 = vld [vmem:[#allocation5 + $0x60] sm:$0xff]  }
 0x208   :  { %v1763_v45 = vrot.slane %v1755_v27, %v4221_v24  ;;  %v3685_v27 = vld [vmem:[%s4403_s4 + $0x190] ss:$8 sps:$4 sm:$0xff]  }
 0x20f   :  { %v3743_v35 = vpop.eup %3742 }
 0x210   :  { %v3745_v37 = vpop.eup %3744  ;;  %v1745_v38 = vmul.f32 %v3743_v35, %v1734_v33  ;;  %v3696_v33 = vld [vmem:[%s4403_s4 + $0x1c4] ss:$8 sps:$4 sm:$0xff]   ;;  %v3699_v35 = vld [vmem:[%s4403_s4 + $0x1d4] ss:$8 sps:$4 sm:$0xff]  }
 0x211   :  { %v1746_v39 = vmul.f32 %v3745_v37, %v1738_v34  ;;  %v3694_v34 = vld [vmem:[%s4403_s4 + $0x1c0] ss:$8 sps:$4 sm:$0xff]   ;;  %v3702_v37 = vld [vmem:[%s4403_s4 + $0x1e4] ss:$8 sps:$4 sm:$0xff]  }
 0x212   :  { %v1749_v22 = vmul.f32 %v1745_v38, %v1672_v5  ;;  %v1792_v40 = vrot.slane %v1745_v38, %v4205_v59  ;;  %v3700_v38 = vld [vmem:[%s4403_s4 + $0x1e0] ss:$8 sps:$4 sm:$0xff]  }
 0x213   :  { %v1750_v41 = vmul.f32 %v1746_v39, %v1673_v8  ;;  %v1796_v49 = vrot.slane %v1746_v39, %v4205_v59  ;;  %v3705_v39 = vld [vmem:[%s4403_s4 + $0x1f4] ss:$8 sps:$4 sm:$0xff]  }
 0x214   :  { %v1799_v42 = vmul.f32 %v1792_v40, %v4186_v26  ;;  %v1797_v26 = vmul.f32 %v4169_v56, %v1784_v48  ;;  %v3658_v56 = vld [vmem:[%s4403_s4 + $0x100] ss:$8 sps:$4 sm:$0xff]   ;;  %v3711_v48 = vld [vmem:[#allocation5 + $0x10] sm:$0xff]  }
 0x215   :  { %v1756_v43 = vcombine.low %v1749_v22, %v1750_v41  ;;  %v1800_v53 = vmul.f32 %v1796_v49, %v4193_v31  ;;  %v3663_v31 = vld [vmem:[%s4403_s4 + $0x114] ss:$8 sps:$4 sm:$0xff]   ;;  %v3703_v22 = vld [vmem:[%s4403_s4 + $0x1f0] ss:$8 sps:$4 sm:$0xff]  }
 0x216   :  { %v3712_v49 = vld [vmem:[#allocation5 + $0x58] sm:$0xff]  }
 0x217   :  { %v1770_v44 = vrot.slane %v1756_v43, %v4221_v24  ;;  %v3707_v43 = vld [vmem:[#allocation5] sm:$0xff]  }
 0x219   :  { %v1771_v46 = vcombine.low %v1763_v45, %v1770_v44  ;;  %v3708_v44 = vld [vmem:[#allocation5 + $0x48] sm:$0xff]  }
 0x21a   :  { %v3709_v45 = vld [vmem:[#allocation5 + $0x8] sm:$0xff]  }
 0x21b   :  { %v1778_v47 = vrot.slane %v1771_v46, %v4221_v24  ;;  %v3710_v46 = vld [vmem:[#allocation5 + $0x50] sm:$0xff]  }
 0x21d   :  { %v1780_v52 = vsub.f32 %v1644_v50, %v1778_v47  ;;  %v3713_v50 = vld [vmem:[#allocation5 + $0x18] sm:$0xff]   ;;  %v3715_v47 = vld [vmem:[#allocation5 + $0x20] sm:$0xff]  }
 0x21f   :  { %v1809_v55 = vrot.slane %v1780_v52, %v4211_v2  ;;  %v1805_v57 = vrot.slane %v1780_v52, %v4205_v59  ;;  %v1817_v60 = vrot.slane %v1780_v52, %v1737_v29  ;;  %v1813_v61 = vrot.slane %v1780_v52, %v1733_v28  ;;  %v3690_v28 = vld [vmem:[%s4403_s4 + $0x1a4] ss:$8 sps:$4 sm:$0xff]   ;;  %v3688_v29 = vld [vmem:[%s4403_s4 + $0x1a0] ss:$8 sps:$4 sm:$0xff]  }
 0x220   :  { %v3716_v52 = vld [vmem:[#allocation5 + $0x68] sm:$0xff]  }
 0x221   :  { %v1823_v62 = vadd.f32 %v1809_v55, %v1798_v54  ;;  %v1822_v63 = vadd.f32 %v1805_v57, %v1797_v26  ;;  %v1825_v1 = vadd.f32 %v1817_v60, %v1800_v53  ;;  %v4238_v3 = vadd.f32 %v1813_v61, %v1799_v42  ;;  %v3706_v42 = vld [vmem:[#allocation5 + $0x40] sm:$0xff]   ;;  %v3717_v26 = vld [vmem:[#allocation5 + $0x28] sm:$0xff]   ;;  %v3718_v53 = vld [vmem:[#allocation5 + $0x70] sm:$0xff]  }
 0x222   :  { %3190 = vmatprep.subr.bf16.mxu1 %v3706_v42  ;;  %v3719_v54 = vld [vmem:[#allocation5 + $0x30] sm:$0xff]   ;;  %v3720_v55 = vld [vmem:[#allocation5 + $0x78] sm:$0xff]  }
 0x223   :  { %v1827_v4 = vmax.f32 %v1823_v62, 0.0  ;;  %v1826_v5 = vmax.f32 %v1822_v63, 0.0  ;;  %v1829_v6 = vmax.f32 %v1825_v1, 0.0  ;;  %v1828_v40 = vmax.f32 %v4238_v3, 0.0  ;;  %3191 = vmatpush3.bf16.msra.mxu1 %v3707_v43  ;;  %v3721_v57 = vld [vmem:[#allocation5 + $0x38] sm:$0xff]  }
 0x224   :  { %3192 = vmatprep.subr.bf16.mxu1 %v3708_v44 }
 0x225   :  { %v1831_v7 = vpack.c.bf16 %v1827_v4, %v1827_v4  ;;  %v1830_v58 = vpack.c.bf16 %v1826_v5, %v1826_v5  ;;  %v1833_v8 = vpack.c.bf16 %v1829_v6, %v1829_v6  ;;  %v1832_v41 = vpack.c.bf16 %v1828_v40, %v1828_v40 }
 0x227   :  { %2250 = vmatprep.mubr.bf16.mxu0 %v1831_v7  ;;  %3193 = vmatpush3.bf16.msra.mxu1 %v3709_v45 }
 0x228   :  { %2251 = vmatmul.mubr.bf16.vlgmr.msra.gmra.mrb[4].mxu0 %v1830_v58  ;;  %3194 = vmatprep.subr.bf16.mxu1 %v3710_v46 }
 0x229   :  { %2260 = vmatpush1.bf16.msra.mxu0 %v3658_v56  ;;  %2291 = vmatprep.mubr.bf16.mxu0 %v1833_v8 }
 0x22a   :  { %2261 = vmatprep.subr.bf16.mxu0 %v3663_v31 }
 0x22b   :  { %3195 = vmatpush3.bf16.msra.mxu1 %v3711_v48 }
 0x22c   :  { %3196 = vmatprep.subr.bf16.mxu1 %v3712_v49  ;;  %v2301_v49 = vld [vmem:[%s4405_s6] sm:$0x3] }
 0x22d   :  { %2262 = vmatpush1.bf16.msra.mxu0 %v3661_v9 }
 0x22e   :  { %2263 = vmatprep.subr.bf16.mxu0 %v3666_v10 }
 0x22f   :  { %3197 = vmatpush3.bf16.msra.mxu1 %v3713_v50 }
 0x230   :  { %3198 = vmatprep.subr.bf16.mxu1 %v3714_v51 }
 0x231   :  { %2264 = vmatpush1.bf16.msra.mxu0 %v3664_v11 }
 0x232   :  { %2265 = vmatprep.subr.bf16.mxu0 %v3669_v12 }
 0x233   :  { %3199 = vmatpush3.bf16.msra.mxu1 %v3715_v47 }
 0x234   :  { %3200 = vmatprep.subr.bf16.mxu1 %v3716_v52 }
 0x235   :  { %2266 = vmatpush1.bf16.msra.mxu0 %v3667_v13 }
 0x236   :  { %2267 = vmatprep.subr.bf16.mxu0 %v3672_v14 }
 0x237   :  { %3201 = vmatpush3.bf16.msra.mxu1 %v3717_v26 }
 0x238   :  { %3202 = vmatprep.subr.bf16.mxu1 %v3718_v53 }
 0x239   :  { %2268 = vmatpush1.bf16.msra.mxu0 %v3670_v15 }
 0x23a   :  { %2269 = vmatprep.subr.bf16.mxu0 %v3675_v17 }
 0x23b   :  { %3203 = vmatpush3.bf16.msra.mxu1 %v3719_v54 }
 0x23c   :  { %3204 = vmatprep.subr.bf16.mxu1 %v3720_v55 }
 0x23d   :  { %2270 = vmatpush1.bf16.msra.mxu0 %v3673_v18 }
 0x23e   :  { %2271 = vmatprep.subr.bf16.mxu0 %v3678_v19 }
 0x23f   :  { %3205 = vmatpush3.bf16.msra.mxu1 %v3721_v57 }
 0x241   :  { %2272 = vmatpush1.bf16.msra.mxu0 %v3676_v16 }
 0x242   :  { %2273 = vmatprep.subr.bf16.mxu0 %v3681_v20 }
 0x245   :  { %2274 = vmatpush1.bf16.msra.mxu0 %v3679_v21 }
 0x246   :  { %2275 = vmatprep.subr.bf16.mxu0 %v3684_v23 }
 0x249   :  { %2276 = vmatpush1.bf16.msra.mxu0 %v3682_v0 }
 0x24a   :  { %2277 = vmatprep.subr.bf16.mxu0 %v3687_v25 }
 0x24d   :  { %2278 = vmatpush1.bf16.msra.mxu0 %v3685_v27 }
 0x24e   :  { %2279 = vmatprep.subr.bf16.mxu0 %v3690_v28 }
 0x251   :  { %2280 = vmatpush1.bf16.msra.mxu0 %v3688_v29 }
 0x252   :  { %2281 = vmatprep.subr.bf16.mxu0 %v3693_v30 }
 0x255   :  { %2282 = vmatpush1.bf16.msra.mxu0 %v3691_v32 }
 0x256   :  { %2283 = vmatprep.subr.bf16.mxu0 %v3696_v33 }
 0x259   :  { %2284 = vmatpush1.bf16.msra.mxu0 %v3694_v34 }
 0x25a   :  { %2285 = vmatprep.subr.bf16.mxu0 %v3699_v35 }
 0x25d   :  { %2286 = vmatpush1.bf16.msra.mxu0 %v3697_v36 }
 0x25e   :  { %2287 = vmatprep.subr.bf16.mxu0 %v3702_v37 }
 0x261   :  { %2288 = vmatpush1.bf16.msra.mxu0 %v3700_v38  ;;  %v2300_v38 = vld [vmem:[%s4404_s5] sm:$0x3] }
 0x262   :  { %2289 = vmatprep.subr.bf16.mxu0 %v3705_v39  ;;  %v2344_v39 = vrot.slane %v2300_v38, %v4205_v59 }
 0x265   :  { %2290 = vmatpush1.bf16.msra.mxu0 %v3703_v22  ;;  %v2348_v22 = vrot.slane %v2300_v38, %v4211_v2 }
 0x268   :  { %2292 = vmatmul.mubr.bf16.vlgmr.msra.gmra.mrb[4].mxu0 %v1832_v41 }
 0x33b   :  { %v2293_v60 = vpop.f32.mrb[4].mxu0 }
 0x33c   :  { %v2302_v61 = vrot.slane %v2293_v60, 4  ;;  %v2316_v62 = vmul.f32 %v2293_v60, %v2293_v60  ;;  %v2295_v63 = vpop.f32.mrb[5].mxu0 }
 0x33d   :  { %v2308_v1 = vrot.slane %v2295_v63, 4  ;;  %v2317_v3 = vmul.f32 %v2295_v63, %v2295_v63  ;;  %v2297_v4 = vpop.f32.mrb[6].mxu0 }
 0x33e   :  { %v2303_v5 = vadd.f32 %v2302_v61, %v2293_v60  ;;  %v2318_v6 = vrot.slane %v2316_v62, 4  ;;  %v2298_v7 = vpop.f32.mrb[7].mxu0 }
 0x33f   :  { %v2309_v56 = vadd.f32 %v2308_v1, %v2295_v63  ;;  %v2324_v58 = vrot.slane %v2317_v3, 4  ;;  %v3727_v7 = vld [vmem:[#allocation7 + $0x28] sm:$0xff]  }
 0x340   :  { %v2304_v31 = vrot.slane %v2303_v5, 2  ;;  %v2319_v8 = vadd.f32 %v2318_v6, %v2316_v62  ;;  %v3887_v6 = vmov 0.0  }
 0x341   :  { %v2310_v9 = vrot.slane %v2309_v56, 2  ;;  %v2325_v10 = vadd.f32 %v2324_v58, %v2317_v3  ;;  %3230 = vmatprep.subr.bf16.mxu1 %v3887_v6  ;;  %v3729_v58 = vld [vmem:[#allocation7 + $0x38] sm:$0xff]  }
 0x342   :  { %v2305_v11 = vadd.f32 %v2304_v31, %v2303_v5  ;;  %v2320_v12 = vrot.slane %v2319_v8, 2  ;;  %v3722_v5 = vld [vmem:[#allocation7] sm:$0xff]  }
 0x343   :  { %v2311_v13 = vadd.f32 %v2310_v9, %v2309_v56  ;;  %v2326_v14 = vrot.slane %v2325_v10, 2  ;;  %v3728_v56 = vld [vmem:[#allocation7 + $0x30] sm:$0xff]  }
 0x344   :  { %v2306_v15 = vrot.slane %v2305_v11, 1  ;;  %v2321_v17 = vadd.f32 %v2320_v12, %v2319_v8 }
 0x345   :  { %v2312_v18 = vrot.slane %v2311_v13, 1  ;;  %v2327_v19 = vadd.f32 %v2326_v14, %v2325_v10 }
 0x346   :  { %v2307_v16 = vadd.f32 %v2306_v15, %v2305_v11  ;;  %v2322_v20 = vrot.slane %v2321_v17, 1 }
 0x347   :  { %v2313_v21 = vadd.f32 %v2312_v18, %v2311_v13  ;;  %v2328_v23 = vrot.slane %v2327_v19, 1 }
 0x348   :  { %v2314_v0 = vmul.f32 0.125, %v2307_v16  ;;  %v2323_v25 = vadd.f32 %v2322_v20, %v2321_v17 }
 0x349   :  { %v2315_v27 = vmul.f32 0.125, %v2313_v21  ;;  %v2329_v28 = vadd.f32 %v2328_v23, %v2327_v19 }
 0x34a   :  { %v2330_v29 = vmul.f32 0.125, %v2323_v25  ;;  %v2332_v30 = vmul.f32 %v2314_v0, %v2314_v0 }
 0x34b   :  { %v2331_v32 = vmul.f32 0.125, %v2329_v28  ;;  %v2333_v33 = vmul.f32 %v2315_v27, %v2315_v27 }
 0x34c   :  { %v2334_v34 = vsub.f32 %v2330_v29, %v2332_v30 }
 0x34d   :  { %v2335_v35 = vsub.f32 %v2331_v32, %v2333_v33  ;;  %v2569_v33 = vld [vmem:[%s4407_s8] sm:$0x1] }
 0x34e   :  { %v2336_v36 = vadd.f32 1e-05, %v2334_v34 }
 0x34f   :  { %v2337_v37 = vadd.f32 1e-05, %v2335_v35 }
 0x350   :  { %3746 = vrsqrt.f32 %v2336_v36  ;;  %v2570_v36 = vld [vmem:[%s4408_s9] sm:$0x1] }
 0x351   :  { %3748 = vrsqrt.f32 %v2337_v37 }
 0x35a   :  { %v3747_v40 = vpop.eup %3746 }
 0x35b   :  { %v3749_v41 = vpop.eup %3748  ;;  %v2351_v42 = vmul.f32 %v3747_v40, %v2344_v39 }
 0x35c   :  { %v2352_v43 = vmul.f32 %v3749_v41, %v2348_v22 }
 0x35d   :  { %v2353_v44 = vmul.f32 %v2351_v42, %v2314_v0  ;;  %v2377_v50 = vrot.slane %v2351_v42, %v4205_v59 }
 0x35e   :  { %v2354_v45 = vmul.f32 %v2352_v43, %v2315_v27  ;;  %v2381_v51 = vrot.slane %v2352_v43, %v4205_v59 }
 0x35f   :  { %v2382_v26 = vmul.f32 %v2377_v50, %v2293_v60  ;;  %v3725_v60 = vld [vmem:[#allocation7 + $0x18] sm:$0xff]   ;;  %v3735_v50 = vld [vmem:[#allocation8 + $0x28] sm:$0xff]  }
 0x360   :  { %v2357_v46 = vcombine.low %v2353_v44, %v2354_v45  ;;  %v2383_v53 = vmul.f32 %v2381_v51, %v2295_v63  ;;  %v3726_v63 = vld [vmem:[#allocation7 + $0x20] sm:$0xff]   ;;  %v3731_v45 = vld [vmem:[#allocation8 + $0x8] sm:$0xff]   ;;  %v3736_v51 = vld [vmem:[#allocation8 + $0x30] sm:$0xff]  }
 0x361   :  { %v3730_v44 = vld [vmem:[#allocation8] sm:$0xff]  }
 0x362   :  { %v2364_v48 = vrot.slane %v2357_v46, %v4221_v24  ;;  %v3732_v46 = vld [vmem:[#allocation8 + $0x10] sm:$0xff]  }
 0x364   :  { %v2371_v47 = vrot.slane %v2364_v48, %v4221_v24  ;;  %v3723_v24 = vld [vmem:[#allocation7 + $0x8] sm:$0xff]   ;;  %v3733_v48 = vld [vmem:[#allocation8 + $0x18] sm:$0xff]  }
 0x366   :  { %v2373_v52 = vsub.f32 %v2301_v49, %v2371_v47  ;;  %v3734_v49 = vld [vmem:[#allocation8 + $0x20] sm:$0xff]   ;;  %v3737_v47 = vld [vmem:[#allocation8 + $0x38] sm:$0xff]  }
 0x368   :  { %v2392_v54 = vrot.slane %v2373_v52, %v4211_v2  ;;  %v2388_v55 = vrot.slane %v2373_v52, %v4205_v59  ;;  %v3724_v2 = vld [vmem:[#allocation7 + $0x10] sm:$0xff]  }
 0x36a   :  { %v2396_v57 = vadd.f32 %v2392_v54, %v2383_v53  ;;  %v2395_v61 = vadd.f32 %v2388_v55, %v2382_v26 }
 0x36c   :  { %v2398_v62 = vmax.f32 %v2396_v57, 0.0  ;;  %v2397_v1 = vmax.f32 %v2395_v61, 0.0 }
 0x36e   :  { %v2400_v3 = vpack.c.bf16 %v2398_v62, %v2398_v62  ;;  %v2399_v4 = vpack.c.bf16 %v2397_v1, %v2397_v1 }
 0x370   :  { %2561 = vmatprep.mubr.bf16.mxu1 %v2400_v3 }
 0x371   :  { %2562 = vmatmul.mubr.bf16.vlgmr.msra.gmra.mrb[8].mxu1 %v2399_v4 }
 0x372   :  { %3231 = vmatpush3.bf16.msra.mxu1 %v3722_v5  ;;  %3246 = vmatprep.mubr.msk.bf16.mxu1 %vm3888_vm1, %v3887_v6 }
 0x373   :  { %3232 = vmatprep.subr.bf16.mxu1 %v3887_v6 }
 0x376   :  { %3233 = vmatpush3.bf16.msra.mxu1 %v3723_v24 }
 0x377   :  { %3234 = vmatprep.subr.bf16.mxu1 %v3887_v6 }
 0x37a   :  { %3235 = vmatpush3.bf16.msra.mxu1 %v3724_v2 }
 0x37b   :  { %3236 = vmatprep.subr.bf16.mxu1 %v3887_v6 }
 0x37e   :  { %3237 = vmatpush3.bf16.msra.mxu1 %v3725_v60 }
 0x37f   :  { %3238 = vmatprep.subr.bf16.mxu1 %v3887_v6 }
 0x382   :  { %3239 = vmatpush3.bf16.msra.mxu1 %v3726_v63 }
 0x383   :  { %3240 = vmatprep.subr.bf16.mxu1 %v3887_v6 }
 0x386   :  { %3241 = vmatpush3.bf16.msra.mxu1 %v3727_v7 }
 0x387   :  { %3242 = vmatprep.subr.bf16.mxu1 %v3887_v6 }
 0x38a   :  { %3243 = vmatpush3.bf16.msra.mxu1 %v3728_v56 }
 0x38b   :  { %3244 = vmatprep.subr.bf16.mxu1 %v3887_v6 }
 0x38e   :  { %3245 = vmatpush3.bf16.msra.mxu1 %v3729_v58 }
 0x38f   :  { %3250 = vmatprep.subr.bf16.mxu1 %v3887_v6 }
 0x444   :  { %v3206_v31 = vpop.f32.mrb[8].mxu1 }
 0x445   :  { %v3207_v8 = vpop.f32.mrb[9].mxu1 }
 0x446   :  { %v3208_v9 = vadd.f32 %v3207_v8, %v3206_v31  ;;  %v3209_v10 = vpop.f32.mrb[10].mxu1 }
 0x447   :  { %v3210_v11 = vpop.f32.mrb[11].mxu1 }
 0x448   :  { %v2571_v12 = vrot.slane %v3208_v9, 4  ;;  %v2578_v13 = vmul.f32 %v3208_v9, %v3208_v9 }
 0x44a   :  { %v2572_v14 = vadd.f32 %v3208_v9, %v2571_v12  ;;  %v2579_v15 = vrot.slane %v2578_v13, 4  ;;  %v2712_v12 = vld [vmem:[%s4411_s12] sm:$0x1] }
 0x44c   :  { %v2573_v17 = vrot.slane %v2572_v14, 2  ;;  %v2580_v18 = vadd.f32 %v2579_v15, %v2578_v13 }
 0x44e   :  { %v2574_v19 = vadd.f32 %v2573_v17, %v2572_v14  ;;  %v2581_v16 = vrot.slane %v2580_v18, 2 }
 0x450   :  { %v2575_v20 = vrot.slane %v2574_v19, 1  ;;  %v2582_v21 = vadd.f32 %v2581_v16, %v2580_v18 }
 0x452   :  { %v2576_v23 = vadd.f32 %v2575_v20, %v2574_v19  ;;  %v2583_v0 = vrot.slane %v2582_v21, 1 }
 0x454   :  { %v2577_v25 = vmul.f32 0.125, %v2576_v23  ;;  %v2584_v27 = vadd.f32 %v2583_v0, %v2582_v21  ;;  %v3181_v21 = vld [vmem:[%s4413_s14] ss:$0 sm:$0xff] }
 0x456   :  { %v2585_v28 = vmul.f32 0.125, %v2584_v27  ;;  %v2586_v29 = vmul.f32 %v2577_v25, %v2577_v25 }
 0x458   :  { %v2587_v30 = vsub.f32 %v2585_v28, %v2586_v29 }
 0x45a   :  { %v2588_v32 = vadd.f32 1e-05, %v2587_v30 }
 0x45c   :  { %3750 = vrsqrt.f32 %v2588_v32 }
 0x466   :  { %v3751_v34 = vpop.eup %3750 }
 0x467   :  { %v2590_v35 = vmul.f32 %v3751_v34, %v2569_v33 }
 0x469   :  { %v2596_v37 = vrot.slane %v2590_v35, %v4205_v59  ;;  %v2591_v38 = vmul.f32 %v2590_v35, %v2577_v25 }
 0x46b   :  { %v2592_v39 = vsub.f32 %v2570_v36, %v2591_v38  ;;  %v2597_v22 = vmul.f32 %v3208_v9, %v2596_v37  ;;  %v2711_v9 = vld [vmem:[%s4410_s11] sm:$0x1]  ;;  %s3889_s11 = smov [#allocation10]  }
 0x46c   :  { %s2877_s12 = sshll.u32 %s3889_s11, 4  ;;  %s2878_s12 = int_to_ptr.vmem [resolvable:$true] %s2877_s12 }
 0x46d   :  { %v2602_v40 = vrot.slane %v2592_v39, %v4205_v59  ;;  %s3847_s14 = scalar_lea.vmem %s2878_s12, 128  ;;  %p3852_p5 = scmp.lt.s32.totalorder %s2878_s12, %s2878_s12 }
 0x46e   :  { %p3848_p4 = scmp.ne.s32.totalorder %s2878_s12, %s3847_s14  ;;  %p3853_p6 = scmp.lt.s32.totalorder %s3847_s14, %s3847_s14 }
 0x46f   :  { %v2604_v41 = vadd.f32 %v2602_v40, %v2597_v22 }
 0x470   :  { %p3854_p7 = por %p3853_p6, %p3852_p5 }
 0x471   :  { %v2605_v42 = vmax.f32 %v2604_v41, 0.0 }
 0x472   :  { %p3855_p8 = pnand %p3854_p7, %p3848_p4 }
 0x473   :  { %v2606_v43 = vpack.c.bf16 %v2605_v42, %v2605_v42 }
 0x475   :  { %3247 = vmatmul.mubr.bf16.vlgmr.msra.gmra.mrb[12].mxu1 %v2606_v43 }
 0x476   :  { %3266 = vmatprep.mubr.msk.bf16.mxu1 %vm3888_vm1, %v3887_v6  ;;  %3251 = vmatpush3.bf16.msra.mxu1 %v3730_v44 }
 0x477   :  { %3252 = vmatprep.subr.bf16.mxu1 %v3887_v6 }
 0x47a   :  { %3253 = vmatpush3.bf16.msra.mxu1 %v3731_v45 }
 0x47b   :  { %3254 = vmatprep.subr.bf16.mxu1 %v3887_v6 }
 0x47e   :  { %3255 = vmatpush3.bf16.msra.mxu1 %v3732_v46 }
 0x47f   :  { %3256 = vmatprep.subr.bf16.mxu1 %v3887_v6 }
 0x482   :  { %3257 = vmatpush3.bf16.msra.mxu1 %v3733_v48 }
 0x483   :  { %3258 = vmatprep.subr.bf16.mxu1 %v3887_v6 }
 0x486   :  { %3259 = vmatpush3.bf16.msra.mxu1 %v3734_v49 }
 0x487   :  { %3260 = vmatprep.subr.bf16.mxu1 %v3887_v6 }
 0x48a   :  { %3261 = vmatpush3.bf16.msra.mxu1 %v3735_v50 }
 0x48b   :  { %3262 = vmatprep.subr.bf16.mxu1 %v3887_v6 }
 0x48e   :  { %3263 = vmatpush3.bf16.msra.mxu1 %v3736_v51 }
 0x48f   :  { %3264 = vmatprep.subr.bf16.mxu1 %v3887_v6 }
 0x492   :  { %3265 = vmatpush3.bf16.msra.mxu1 %v3737_v47 }
 0x548   :  { %v2705_v52 = vpop.f32.mrb[12].mxu1 }
 0x549   :  { %v2713_v26 = vrot.slane %v2705_v52, 4  ;;  %v2720_v53 = vmul.f32 %v2705_v52, %v2705_v52  ;;  %v3248_v54 = vpop.f32.mrb[13].mxu1 }
 0x54a   :  { %v2708_v55 = vpop.f32.mrb[14].mxu1 }
 0x54b   :  { %v2714_v57 = vadd.f32 %v2713_v26, %v2705_v52  ;;  %v2721_v61 = vrot.slane %v2720_v53, 4  ;;  %v3249_v62 = vpop.f32.mrb[15].mxu1 }
 0x54d   :  { %v2715_v1 = vrot.slane %v2714_v57, 2  ;;  %v2722_v3 = vadd.f32 %v2721_v61, %v2720_v53 }
 0x54f   :  { %v2716_v4 = vadd.f32 %v2715_v1, %v2714_v57  ;;  %v2723_v5 = vrot.slane %v2722_v3, 2 }
 0x551   :  { %v2717_v24 = vrot.slane %v2716_v4, 1  ;;  %v2724_v2 = vadd.f32 %v2723_v5, %v2722_v3 }
 0x553   :  { %v2718_v60 = vadd.f32 %v2717_v24, %v2716_v4  ;;  %v2725_v63 = vrot.slane %v2724_v2, 1 }
 0x555   :  { %v2719_v7 = vmul.f32 0.125, %v2718_v60  ;;  %v2726_v6 = vadd.f32 %v2725_v63, %v2724_v2 }
 0x557   :  { %v2727_v56 = vmul.f32 0.125, %v2726_v6  ;;  %v2728_v58 = vmul.f32 %v2719_v7, %v2719_v7 }
 0x559   :  { %v2729_v31 = vsub.f32 %v2727_v56, %v2728_v58 }
 0x55b   :  { %v2730_v8 = vadd.f32 1e-05, %v2729_v31 }
 0x55d   :  { %3752 = vrsqrt.f32 %v2730_v8 }
 0x567   :  { %v3753_v10 = vpop.eup %3752 }
 0x568   :  { %v2732_v11 = vmul.f32 %v3753_v10, %v2711_v9 }
 0x56a   :  { %v2733_v13 = vmul.f32 %v2732_v11, %v2719_v7  ;;  %v2738_v14 = vrot.slane %v2732_v11, %v4205_v59 }
 0x56c   :  { %v2734_v15 = vsub.f32 %v2712_v12, %v2733_v13  ;;  %v2739_v17 = vmul.f32 %v2738_v14, %v2705_v52 }
 0x56e   :  { %v2744_v18 = vrot.slane %v2734_v15, %v4205_v59 }
 0x570   :  { %v2746_v19 = vadd.f32 %v2744_v18, %v2739_v17 }
 0x572   :  { %v2747_v16 = vmax.f32 %v2746_v19, 0.0 }
 0x574   :  { %v2748_v20 = vpack.c.bf16 %v2747_v16, %v2747_v16 }
 0x576   :  { %3267 = vmatmul.mubr.bf16.vlgmr.msra.gmra.mrb[16].mxu1 %v2748_v20 }
 0x649   :  { %v2854_v23 = vpop.f32.mrb[16].mxu1 }
 0x64a   :  { %v2855_v0 = vadd.f32 %v3181_v21, %v2854_v23  ;;  %v3268_v25 = vpop.f32.mrb[17].mxu1 }
 0x64b   :  { %v2857_v27 = vpop.f32.mrb[18].mxu1 }
 0x64c   :  { %2860 = vmax.xlane.f32.xlu0 %v2855_v0  ;;  %v3269_v28 = vpop.f32.mrb[19].mxu1 }
 0x6d9   :  { %v2861_v29 = vpop.xlane.xlu0 %2860 }
 0x6da   :  { %v2862_v30 = vsub.f32 %v2855_v0, %v2861_v29 }
 0x6dc   :  { %v2863_v32 = vmul.f32 1.442695, %v2862_v30 }
 0x6de   :  { %3754 = vpow2.f32 %v2863_v32 }
 0x6e8   :  { %v3755_v33 = vpop.eup %3754 }
 0x6e9   :  { %2865 = vadd.xlane.f32.xlu0 %v3755_v33 }
 0x776   :  { %v2866_v59 = vpop.xlane.xlu0 %2865 }
 0x777   :  { %3756 = vlog2.f32 %v2866_v59 }
 0x781   :  { %v3757_v34 = vpop.eup %3756 }
 0x782   :  { %v2868_v35 = vmul.f32 0.6931472, %v3757_v34 }
 0x784   :  { %v2869_v36 = vsub.f32 %v2862_v30, %v2868_v35 }
 0x786   :  { %2870 = vst [vmem:[#allocation10] sm:$0xff] %v2869_v36 }
 0x787   :  { %3858 = shalt.err (!%p3855_p8)
}
 0x788   :  { %s3859_s18 = scalar_lea.hbm %s4414_s15, 128 }
 0x789   :  { %p3860_p9 = scmp.ne.s32.totalorder %s4414_s15, %s3859_s18  ;;  %p3863_p10 = scmp.lt.u32.totalorder %s3859_s18, %s4414_s15 }
 0x78b   :  { %p3865_p11 = pnand %p3863_p10, %p3860_p9 }
 0x78d   :  { %3868 = shalt.err (!%p3865_p11)
}
 0x78e   :  { %2880 = dma.vmem_to_hbm [thread:$0]  %s2878_s12, 128, %s4414_s15, [#allocation4]  }
 0x78f   :  { %3875 = dma.done.wait [#allocation4], 128  }
 0x790   :  { %3876 = vsyncadd [#allocation4], 4294967168 }
 0x791   :  { %2884 = vsyncpa [#allocation3], 1 }
 0x792   :  { %2885 = vsyncpa [#allocation6], 1 }
 0x793   :  { %2886 = vsyncpa [#allocation9], 1 }
 0x794   :  { %2887 = vsyncpa [#allocation4], 1 }

</bundles_post_ra>
